<compile_context>
chip_gen: v5e
topology: v5e:2x2
jax: 0.10.0
libtpu: 0.0.40
codegen_flags: <defaults>
</compile_context>

<pallas_src>
import jax
import jax.numpy as jnp
from jax import lax
from jax.experimental import pallas as pl
from jax.experimental.pallas import tpu as pltpu

# ---------------- model hyper-parameters (from RNNClassifier.__init__) -------
VOCAB_SIZE = 50
EMB_DIM = 32        # word_embedding_dim
HIDDEN_DIM = 64     # hidden_dim
HIDDEN_PAD = 128    # per-gate lane padding (whole-vreg slices)
PAD_IDX = 0         # encoder.token_to_index('<PAD>')

BATCH = 4
MAX_LEN = 8


# ---------------------------- Pallas kernel ----------------------------------
def lstm_last_step_kernel(gx_ref, lastt_ref, whh_ref, wfc_ref, bfc_ref,
                          out_ref):
    """Statically-unrolled LSTM recurrence with h/c/h_last carried in vregs.

    gx_ref   : (T, B, 4*HP) f32  VMEM  precomputed emb@W_ih + (b_ih+b_hh),
                                       gate order (i, f, o, g), lane-padded
    lastt_ref: (B, 1)  int32     VMEM  len-1  (-1 for padded batch rows)
    whh_ref  : (HP, 4*HP) bf16   VMEM  recurrent weight (reordered, padded)
    wfc_ref  : (1, HP) f32       VMEM  FC weight row (zero lane-padded)
    bfc_ref  : (1, 1)  f32       VMEM  FC bias
    out_ref  : (B, 1)  f32       VMEM  logits
    """
    T, B, G = gx_ref.shape
    HP = G // 4

    whh = whh_ref[...]                       # (HP, 4*HP) bf16, loaded once
    last_t = lastt_ref[...]                  # (B, 1) int32, loaded once

    h = jnp.zeros((B, HP), jnp.float32)
    c = jnp.zeros((B, HP), jnp.float32)
    h_last = jnp.zeros((B, HP), jnp.float32)

    for t in range(T):                       # static unroll (T is compile-time)
        # Only the recurrent projection sits on the serial critical path.
        gates = gx_ref[t] + jnp.dot(h.astype(whh.dtype), whh,
                                    preferred_element_type=jnp.float32)

        # Gate order is (i, f, o, g): one fused sigmoid, one tanh per step,
        # all slices at whole-vreg (128-lane) offsets.
        sig = jax.nn.sigmoid(gates[:, 0:3 * HP])
        g_g = jnp.tanh(gates[:, 3 * HP:4 * HP])
        i_g = sig[:, 0:HP]
        f_g = sig[:, HP:2 * HP]
        o_g = sig[:, 2 * HP:3 * HP]

        c = f_g * c + i_g * g_g
        h = o_g * jnp.tanh(c)

        # Keep the hidden state of each sequence's last valid timestep.
        h_last = jnp.where(last_t == t, h, h_last)

    # Linear(H, 1) as VPU multiply + lane reduction (no N=1 MXU matmul).
    out_ref[...] = (jnp.sum(h_last * wfc_ref[...], axis=-1, keepdims=True)
                    + bfc_ref[...])


# --------------------- one-time kernel parameter preparation -----------------
def _reorder_and_pad_cols(m, H, HP):
    """(..., 4H) in PyTorch gate order (i,f,g,o) -> (..., 4*HP) in (i,f,o,g),
    each gate block zero-padded from H to HP lanes."""
    i_b = m[..., 0:H]
    f_b = m[..., H:2 * H]
    g_b = m[..., 2 * H:3 * H]
    o_b = m[..., 3 * H:4 * H]
    pad = lambda x: jnp.pad(x, [(0, 0)] * (x.ndim - 1) + [(0, HP - H)])
    return jnp.concatenate([pad(i_b), pad(f_b), pad(o_b), pad(g_b)], axis=-1)


def prepare_kernel_params(params):
    """Fold embedding lookup + input projection + combined bias into a
    per-vocab gate table, reorder/pad gate columns, pad W_hh rows, cast to
    MXU-native bf16.  Done once, NOT per forward call."""
    H, HP = HIDDEN_DIM, HIDDEN_PAD

    gate_table = (params["embedding"] @ params["w_ih"]
                  + params["bias"]).astype(jnp.float32)            # (V, 4H)
    gate_table = _reorder_and_pad_cols(gate_table, H, HP)          # (V, 4HP)

    w_hh = _reorder_and_pad_cols(params["w_hh"], H, HP)            # (H, 4HP)
    w_hh = jnp.pad(w_hh, ((0, HP - H), (0, 0)))                    # (HP, 4HP)

    w_fc = jnp.pad(params["w_fc"], ((0, 0), (0, HP - H)))          # (1, HP)

    return {
        "gate_table": gate_table,
        "w_hh_bf16": w_hh.astype(jnp.bfloat16),
        "w_fc": w_fc.astype(jnp.float32),
        "b_fc": params["b_fc"].astype(jnp.float32),
    }


# ------------------------------ forward wrapper -------------------------------
def rnn_classifier_forward(padded_sentences, prep):
    """Forward pass equivalent to RNNClassifier.forward (logits, not sigmoid)."""
    B, T = padded_sentences.shape
    B_pad = ((B + 7) // 8) * 8                      # fill the 8-sublane tile

    tokens = padded_sentences.astype(jnp.int32)
    tokens = jnp.pad(tokens, ((0, B_pad - B), (0, 0)),
                     constant_values=PAD_IDX)                       # (Bp, T)
    lengths = jnp.sum(tokens != PAD_IDX, axis=1).astype(jnp.int32)
    last_t = (lengths - 1)[:, None]                 # (Bp, 1); -1 for pad rows

    # Embedding lookup + input projection + bias collapse to one XLA gather.
    gx_all = jnp.transpose(prep["gate_table"][tokens], (1, 0, 2))   # (T,Bp,4HP)

    vmem = pl.BlockSpec(memory_space=pltpu.MemorySpace.VMEM)
    logits = pl.pallas_call(
        lstm_last_step_kernel,
        out_shape=jax.ShapeDtypeStruct((B_pad, 1), jnp.float32),
        in_specs=[vmem, vmem, vmem, vmem, vmem],
        out_specs=vmem,
    )(gx_all, last_t, prep["w_hh_bf16"], prep["w_fc"], prep["b_fc"])

    # torch.stack([...]).squeeze() -> (B,)
    return jnp.squeeze(logits[:B, 0])


# ------------------------- parameter initialization --------------------------
def init_params(key):
    k1, k2, k3, k4, k5, k6, k7 = jax.random.split(key, 7)
    scale = 0.1
    embedding = scale * jax.random.normal(k1, (VOCAB_SIZE, EMB_DIM), jnp.float32)
    embedding = embedding.at[PAD_IDX].set(0.0)                 # padding_idx=PAD

    # PyTorch LSTM params: weight_ih (4H, E), weight_hh (4H, H), two biases.
    w_ih_t = scale * jax.random.normal(k2, (4 * HIDDEN_DIM, EMB_DIM), jnp.float32)
    w_hh_t = scale * jax.random.normal(k3, (4 * HIDDEN_DIM, HIDDEN_DIM), jnp.float32)
    b_ih = scale * jax.random.normal(k4, (4 * HIDDEN_DIM,), jnp.float32)
    b_hh = scale * jax.random.normal(k5, (4 * HIDDEN_DIM,), jnp.float32)

    # Linear(hidden_dim, 1): weight (1, H), bias (1,)
    w_fc = scale * jax.random.normal(k6, (1, HIDDEN_DIM), jnp.float32)
    b_fc = scale * jax.random.normal(k7, (1,), jnp.float32)

    return {
        "embedding": embedding,
        "w_ih": jnp.transpose(w_ih_t),                 # (E, 4H), gate order i,f,g,o
        "w_hh": jnp.transpose(w_hh_t),                 # (H, 4H)
        "bias": (b_ih + b_hh)[None, :],                # (1, 4H)
        "w_fc": w_fc,                                  # (1, H)
        "b_fc": b_fc[None, :],                         # (1, 1)
    }


# ------------------------------ pure-JAX reference ---------------------------
def reference_forward(padded_sentences, params):
    emb = params["embedding"][padded_sentences].astype(jnp.float32)  # (B, T, E)
    lengths = jnp.sum(padded_sentences != PAD_IDX, axis=1)
    B, T, _ = emb.shape
    H = HIDDEN_DIM

    def cell(carry, x_t):
        h, c = carry
        gates = x_t @ params["w_ih"] + h @ params["w_hh"] + params["bias"]
        i = jax.nn.sigmoid(gates[:, 0:H])
        f = jax.nn.sigmoid(gates[:, H:2 * H])
        g = jnp.tanh(gates[:, 2 * H:3 * H])
        o = jax.nn.sigmoid(gates[:, 3 * H:4 * H])
        c_new = f * c + i * g
        h_new = o * jnp.tanh(c_new)
        return (h_new, c_new), h_new

    init = (jnp.zeros((B, H), jnp.float32), jnp.zeros((B, H), jnp.float32))
    _, hs = lax.scan(cell, init, jnp.transpose(emb, (1, 0, 2)))   # (T, B, H)
    h_last = hs[lengths - 1, jnp.arange(B)]                       # (B, H)
    return jnp.squeeze(h_last @ params["w_fc"].T + params["b_fc"])


# ----------------------------------- main -------------------------------------
if __name__ == "__main__":
    key = jax.random.PRNGKey(0)
    pkey, tkey = jax.random.split(key)
    params = init_params(pkey)
    prep = prepare_kernel_params(params)          # one-time, outside the forward

    # Deterministic padded token batch: values in [1, VOCAB), PAD beyond length.
    tokens = jax.random.randint(tkey, (BATCH, MAX_LEN), 1, VOCAB_SIZE,
                                dtype=jnp.int32)
    lengths = jnp.array([8, 5, 3, 6], dtype=jnp.int32)
    pos = jnp.arange(MAX_LEN)[None, :]
    padded_sentences = jnp.where(pos < lengths[:, None], tokens, PAD_IDX)

    out = rnn_classifier_forward(padded_sentences, prep)
    out = jax.block_until_ready(out)

    ref = reference_forward(padded_sentences, params)
    assert out.shape == (BATCH,)
    # bf16 recurrent-matmul operands (f32 accumulation) vs the f32 reference:
    # observed error is O(1e-4) on ~0.1-magnitude logits; 1e-2 gives margin.
    assert jnp.allclose(out, ref, atol=1e-2, rtol=1e-2), (out, ref)

    print("KERNEL_OK")
</pallas_src>

<mosaic_0001>
module attributes {stable_mosaic.version = 11 : i64} {
  func.func @lstm_last_step_kernel(%arg0: memref<8x8x512xf32, #tpu.memory_space<vmem>>, %arg1: memref<8x1xi32, #tpu.memory_space<vmem>>, %arg2: memref<128x512xbf16, #tpu.memory_space<vmem>>, %arg3: memref<1x128xf32, #tpu.memory_space<vmem>>, %arg4: memref<1x1xf32, #tpu.memory_space<vmem>>, %arg5: memref<8x1xf32, #tpu.memory_space<vmem>>) attributes {dimension_semantics = [], scalar_prefetch = 0 : i64, scratch_operands = 0 : i64, tpu.core_type = #tpu.core_type<tc>} {
    %c0 = arith.constant 0 : index
    %c0_0 = arith.constant 0 : index
    %0 = vector.load %arg2[%c0, %c0_0] : memref<128x512xbf16, #tpu.memory_space<vmem>>, vector<128x512xbf16>
    %c0_1 = arith.constant 0 : index
    %c0_2 = arith.constant 0 : index
    %1 = vector.load %arg1[%c0_1, %c0_2] : memref<8x1xi32, #tpu.memory_space<vmem>>, vector<8x1xi32>
    %cst = arith.constant 0.000000e+00 : f32
    %2 = vector.broadcast %cst : f32 to vector<8x128xf32>
    %cst_3 = arith.constant 0.000000e+00 : f32
    %3 = vector.broadcast %cst_3 : f32 to vector<8x128xf32>
    %cst_4 = arith.constant 0.000000e+00 : f32
    %4 = vector.broadcast %cst_4 : f32 to vector<8x128xf32>
    %c0_5 = arith.constant 0 : index
    %c0_6 = arith.constant 0 : index
    %c0_7 = arith.constant 0 : index
    %5 = vector.load %arg0[%c0_5, %c0_6, %c0_7] : memref<8x8x512xf32, #tpu.memory_space<vmem>>, vector<1x8x512xf32>
    %6 = vector.shape_cast %5 : vector<1x8x512xf32> to vector<8x512xf32>
    %7 = arith.truncf %2 : vector<8x128xf32> to vector<8x128xbf16>
    %cst_8 = arith.constant dense<0.000000e+00> : vector<8x512xf32>
    %8 = tpu.matmul %7, %0, %cst_8 {dimension_numbers = #tpu.dot_dimension_numbers<[1], [0], [0], [1], [0, 0, 1, 1], [], []>} : vector<8x128xbf16>, vector<128x512xbf16>, vector<8x512xf32> -> vector<8x512xf32>
    %9 = arith.addf %6, %8 : vector<8x512xf32>
    %10 = vector.extract_strided_slice %9 {offsets = [0, 0], sizes = [8, 384], strides = [1, 1]} : vector<8x512xf32> to vector<8x384xf32>
    %11 = arith.negf %10 : vector<8x384xf32>
    %12 = math.exp %11 : vector<8x384xf32>
    %cst_9 = arith.constant 1.000000e+00 : f32
    %13 = vector.broadcast %cst_9 : f32 to vector<8x384xf32>
    %14 = arith.addf %13, %12 : vector<8x384xf32>
    %15 = arith.divf %13, %14 : vector<8x384xf32>
    %16 = vector.extract_strided_slice %9 {offsets = [0, 384], sizes = [8, 128], strides = [1, 1]} : vector<8x512xf32> to vector<8x128xf32>
    %17 = math.tanh %16 : vector<8x128xf32>
    %18 = vector.extract_strided_slice %15 {offsets = [0, 0], sizes = [8, 128], strides = [1, 1]} : vector<8x384xf32> to vector<8x128xf32>
    %19 = vector.extract_strided_slice %15 {offsets = [0, 128], sizes = [8, 128], strides = [1, 1]} : vector<8x384xf32> to vector<8x128xf32>
    %20 = vector.extract_strided_slice %15 {offsets = [0, 256], sizes = [8, 128], strides = [1, 1]} : vector<8x384xf32> to vector<8x128xf32>
    %21 = arith.mulf %19, %3 : vector<8x128xf32>
    %22 = arith.mulf %18, %17 : vector<8x128xf32>
    %23 = arith.addf %21, %22 : vector<8x128xf32>
    %24 = math.tanh %23 : vector<8x128xf32>
    %25 = arith.mulf %20, %24 : vector<8x128xf32>
    %c0_i32 = arith.constant 0 : i32
    %26 = vector.broadcast %c0_i32 : i32 to vector<8x1xi32>
    %27 = arith.cmpi eq, %1, %26 : vector<8x1xi32>
    %28 = vector.shape_cast %27 : vector<8x1xi1> to vector<8x1xi1>
    %29 = vector.broadcast %28 : vector<8x1xi1> to vector<8x128xi1>
    %30 = arith.select %29, %25, %4 : vector<8x128xi1>, vector<8x128xf32>
    %c1 = arith.constant 1 : index
    %c0_10 = arith.constant 0 : index
    %c0_11 = arith.constant 0 : index
    %31 = vector.load %arg0[%c1, %c0_10, %c0_11] : memref<8x8x512xf32, #tpu.memory_space<vmem>>, vector<1x8x512xf32>
    %32 = vector.shape_cast %31 : vector<1x8x512xf32> to vector<8x512xf32>
    %33 = arith.truncf %25 : vector<8x128xf32> to vector<8x128xbf16>
    %cst_12 = arith.constant dense<0.000000e+00> : vector<8x512xf32>
    %34 = tpu.matmul %33, %0, %cst_12 {dimension_numbers = #tpu.dot_dimension_numbers<[1], [0], [0], [1], [0, 0, 1, 1], [], []>} : vector<8x128xbf16>, vector<128x512xbf16>, vector<8x512xf32> -> vector<8x512xf32>
    %35 = arith.addf %32, %34 : vector<8x512xf32>
    %36 = vector.extract_strided_slice %35 {offsets = [0, 0], sizes = [8, 384], strides = [1, 1]} : vector<8x512xf32> to vector<8x384xf32>
    %37 = arith.negf %36 : vector<8x384xf32>
    %38 = math.exp %37 : vector<8x384xf32>
    %cst_13 = arith.constant 1.000000e+00 : f32
    %39 = vector.broadcast %cst_13 : f32 to vector<8x384xf32>
    %40 = arith.addf %39, %38 : vector<8x384xf32>
    %41 = arith.divf %39, %40 : vector<8x384xf32>
    %42 = vector.extract_strided_slice %35 {offsets = [0, 384], sizes = [8, 128], strides = [1, 1]} : vector<8x512xf32> to vector<8x128xf32>
    %43 = math.tanh %42 : vector<8x128xf32>
    %44 = vector.extract_strided_slice %41 {offsets = [0, 0], sizes = [8, 128], strides = [1, 1]} : vector<8x384xf32> to vector<8x128xf32>
    %45 = vector.extract_strided_slice %41 {offsets = [0, 128], sizes = [8, 128], strides = [1, 1]} : vector<8x384xf32> to vector<8x128xf32>
    %46 = vector.extract_strided_slice %41 {offsets = [0, 256], sizes = [8, 128], strides = [1, 1]} : vector<8x384xf32> to vector<8x128xf32>
    %47 = arith.mulf %45, %23 : vector<8x128xf32>
    %48 = arith.mulf %44, %43 : vector<8x128xf32>
    %49 = arith.addf %47, %48 : vector<8x128xf32>
    %50 = math.tanh %49 : vector<8x128xf32>
    %51 = arith.mulf %46, %50 : vector<8x128xf32>
    %c1_i32 = arith.constant 1 : i32
    %52 = vector.broadcast %c1_i32 : i32 to vector<8x1xi32>
    %53 = arith.cmpi eq, %1, %52 : vector<8x1xi32>
    %54 = vector.shape_cast %53 : vector<8x1xi1> to vector<8x1xi1>
    %55 = vector.broadcast %54 : vector<8x1xi1> to vector<8x128xi1>
    %56 = arith.select %55, %51, %30 : vector<8x128xi1>, vector<8x128xf32>
    %c2 = arith.constant 2 : index
    %c0_14 = arith.constant 0 : index
    %c0_15 = arith.constant 0 : index
    %57 = vector.load %arg0[%c2, %c0_14, %c0_15] : memref<8x8x512xf32, #tpu.memory_space<vmem>>, vector<1x8x512xf32>
    %58 = vector.shape_cast %57 : vector<1x8x512xf32> to vector<8x512xf32>
    %59 = arith.truncf %51 : vector<8x128xf32> to vector<8x128xbf16>
    %cst_16 = arith.constant dense<0.000000e+00> : vector<8x512xf32>
    %60 = tpu.matmul %59, %0, %cst_16 {dimension_numbers = #tpu.dot_dimension_numbers<[1], [0], [0], [1], [0, 0, 1, 1], [], []>} : vector<8x128xbf16>, vector<128x512xbf16>, vector<8x512xf32> -> vector<8x512xf32>
    %61 = arith.addf %58, %60 : vector<8x512xf32>
    %62 = vector.extract_strided_slice %61 {offsets = [0, 0], sizes = [8, 384], strides = [1, 1]} : vector<8x512xf32> to vector<8x384xf32>
    %63 = arith.negf %62 : vector<8x384xf32>
    %64 = math.exp %63 : vector<8x384xf32>
    %cst_17 = arith.constant 1.000000e+00 : f32
    %65 = vector.broadcast %cst_17 : f32 to vector<8x384xf32>
    %66 = arith.addf %65, %64 : vector<8x384xf32>
    %67 = arith.divf %65, %66 : vector<8x384xf32>
    %68 = vector.extract_strided_slice %61 {offsets = [0, 384], sizes = [8, 128], strides = [1, 1]} : vector<8x512xf32> to vector<8x128xf32>
    %69 = math.tanh %68 : vector<8x128xf32>
    %70 = vector.extract_strided_slice %67 {offsets = [0, 0], sizes = [8, 128], strides = [1, 1]} : vector<8x384xf32> to vector<8x128xf32>
    %71 = vector.extract_strided_slice %67 {offsets = [0, 128], sizes = [8, 128], strides = [1, 1]} : vector<8x384xf32> to vector<8x128xf32>
    %72 = vector.extract_strided_slice %67 {offsets = [0, 256], sizes = [8, 128], strides = [1, 1]} : vector<8x384xf32> to vector<8x128xf32>
    %73 = arith.mulf %71, %49 : vector<8x128xf32>
    %74 = arith.mulf %70, %69 : vector<8x128xf32>
    %75 = arith.addf %73, %74 : vector<8x128xf32>
    %76 = math.tanh %75 : vector<8x128xf32>
    %77 = arith.mulf %72, %76 : vector<8x128xf32>
    %c2_i32 = arith.constant 2 : i32
    %78 = vector.broadcast %c2_i32 : i32 to vector<8x1xi32>
    %79 = arith.cmpi eq, %1, %78 : vector<8x1xi32>
    %80 = vector.shape_cast %79 : vector<8x1xi1> to vector<8x1xi1>
    %81 = vector.broadcast %80 : vector<8x1xi1> to vector<8x128xi1>
    %82 = arith.select %81, %77, %56 : vector<8x128xi1>, vector<8x128xf32>
    %c3 = arith.constant 3 : index
    %c0_18 = arith.constant 0 : index
    %c0_19 = arith.constant 0 : index
    %83 = vector.load %arg0[%c3, %c0_18, %c0_19] : memref<8x8x512xf32, #tpu.memory_space<vmem>>, vector<1x8x512xf32>
    %84 = vector.shape_cast %83 : vector<1x8x512xf32> to vector<8x512xf32>
    %85 = arith.truncf %77 : vector<8x128xf32> to vector<8x128xbf16>
    %cst_20 = arith.constant dense<0.000000e+00> : vector<8x512xf32>
    %86 = tpu.matmul %85, %0, %cst_20 {dimension_numbers = #tpu.dot_dimension_numbers<[1], [0], [0], [1], [0, 0, 1, 1], [], []>} : vector<8x128xbf16>, vector<128x512xbf16>, vector<8x512xf32> -> vector<8x512xf32>
    %87 = arith.addf %84, %86 : vector<8x512xf32>
    %88 = vector.extract_strided_slice %87 {offsets = [0, 0], sizes = [8, 384], strides = [1, 1]} : vector<8x512xf32> to vector<8x384xf32>
    %89 = arith.negf %88 : vector<8x384xf32>
    %90 = math.exp %89 : vector<8x384xf32>
    %cst_21 = arith.constant 1.000000e+00 : f32
    %91 = vector.broadcast %cst_21 : f32 to vector<8x384xf32>
    %92 = arith.addf %91, %90 : vector<8x384xf32>
    %93 = arith.divf %91, %92 : vector<8x384xf32>
    %94 = vector.extract_strided_slice %87 {offsets = [0, 384], sizes = [8, 128], strides = [1, 1]} : vector<8x512xf32> to vector<8x128xf32>
    %95 = math.tanh %94 : vector<8x128xf32>
    %96 = vector.extract_strided_slice %93 {offsets = [0, 0], sizes = [8, 128], strides = [1, 1]} : vector<8x384xf32> to vector<8x128xf32>
    %97 = vector.extract_strided_slice %93 {offsets = [0, 128], sizes = [8, 128], strides = [1, 1]} : vector<8x384xf32> to vector<8x128xf32>
    %98 = vector.extract_strided_slice %93 {offsets = [0, 256], sizes = [8, 128], strides = [1, 1]} : vector<8x384xf32> to vector<8x128xf32>
    %99 = arith.mulf %97, %75 : vector<8x128xf32>
    %100 = arith.mulf %96, %95 : vector<8x128xf32>
    %101 = arith.addf %99, %100 : vector<8x128xf32>
    %102 = math.tanh %101 : vector<8x128xf32>
    %103 = arith.mulf %98, %102 : vector<8x128xf32>
    %c3_i32 = arith.constant 3 : i32
    %104 = vector.broadcast %c3_i32 : i32 to vector<8x1xi32>
    %105 = arith.cmpi eq, %1, %104 : vector<8x1xi32>
    %106 = vector.shape_cast %105 : vector<8x1xi1> to vector<8x1xi1>
    %107 = vector.broadcast %106 : vector<8x1xi1> to vector<8x128xi1>
    %108 = arith.select %107, %103, %82 : vector<8x128xi1>, vector<8x128xf32>
    %c4 = arith.constant 4 : index
    %c0_22 = arith.constant 0 : index
    %c0_23 = arith.constant 0 : index
    %109 = vector.load %arg0[%c4, %c0_22, %c0_23] : memref<8x8x512xf32, #tpu.memory_space<vmem>>, vector<1x8x512xf32>
    %110 = vector.shape_cast %109 : vector<1x8x512xf32> to vector<8x512xf32>
    %111 = arith.truncf %103 : vector<8x128xf32> to vector<8x128xbf16>
    %cst_24 = arith.constant dense<0.000000e+00> : vector<8x512xf32>
    %112 = tpu.matmul %111, %0, %cst_24 {dimension_numbers = #tpu.dot_dimension_numbers<[1], [0], [0], [1], [0, 0, 1, 1], [], []>} : vector<8x128xbf16>, vector<128x512xbf16>, vector<8x512xf32> -> vector<8x512xf32>
    %113 = arith.addf %110, %112 : vector<8x512xf32>
    %114 = vector.extract_strided_slice %113 {offsets = [0, 0], sizes = [8, 384], strides = [1, 1]} : vector<8x512xf32> to vector<8x384xf32>
    %115 = arith.negf %114 : vector<8x384xf32>
    %116 = math.exp %115 : vector<8x384xf32>
    %cst_25 = arith.constant 1.000000e+00 : f32
    %117 = vector.broadcast %cst_25 : f32 to vector<8x384xf32>
    %118 = arith.addf %117, %116 : vector<8x384xf32>
    %119 = arith.divf %117, %118 : vector<8x384xf32>
    %120 = vector.extract_strided_slice %113 {offsets = [0, 384], sizes = [8, 128], strides = [1, 1]} : vector<8x512xf32> to vector<8x128xf32>
    %121 = math.tanh %120 : vector<8x128xf32>
    %122 = vector.extract_strided_slice %119 {offsets = [0, 0], sizes = [8, 128], strides = [1, 1]} : vector<8x384xf32> to vector<8x128xf32>
    %123 = vector.extract_strided_slice %119 {offsets = [0, 128], sizes = [8, 128], strides = [1, 1]} : vector<8x384xf32> to vector<8x128xf32>
    %124 = vector.extract_strided_slice %119 {offsets = [0, 256], sizes = [8, 128], strides = [1, 1]} : vector<8x384xf32> to vector<8x128xf32>
    %125 = arith.mulf %123, %101 : vector<8x128xf32>
    %126 = arith.mulf %122, %121 : vector<8x128xf32>
    %127 = arith.addf %125, %126 : vector<8x128xf32>
    %128 = math.tanh %127 : vector<8x128xf32>
    %129 = arith.mulf %124, %128 : vector<8x128xf32>
    %c4_i32 = arith.constant 4 : i32
    %130 = vector.broadcast %c4_i32 : i32 to vector<8x1xi32>
    %131 = arith.cmpi eq, %1, %130 : vector<8x1xi32>
    %132 = vector.shape_cast %131 : vector<8x1xi1> to vector<8x1xi1>
    %133 = vector.broadcast %132 : vector<8x1xi1> to vector<8x128xi1>
    %134 = arith.select %133, %129, %108 : vector<8x128xi1>, vector<8x128xf32>
    %c5 = arith.constant 5 : index
    %c0_26 = arith.constant 0 : index
    %c0_27 = arith.constant 0 : index
    %135 = vector.load %arg0[%c5, %c0_26, %c0_27] : memref<8x8x512xf32, #tpu.memory_space<vmem>>, vector<1x8x512xf32>
    %136 = vector.shape_cast %135 : vector<1x8x512xf32> to vector<8x512xf32>
    %137 = arith.truncf %129 : vector<8x128xf32> to vector<8x128xbf16>
    %cst_28 = arith.constant dense<0.000000e+00> : vector<8x512xf32>
    %138 = tpu.matmul %137, %0, %cst_28 {dimension_numbers = #tpu.dot_dimension_numbers<[1], [0], [0], [1], [0, 0, 1, 1], [], []>} : vector<8x128xbf16>, vector<128x512xbf16>, vector<8x512xf32> -> vector<8x512xf32>
    %139 = arith.addf %136, %138 : vector<8x512xf32>
    %140 = vector.extract_strided_slice %139 {offsets = [0, 0], sizes = [8, 384], strides = [1, 1]} : vector<8x512xf32> to vector<8x384xf32>
    %141 = arith.negf %140 : vector<8x384xf32>
    %142 = math.exp %141 : vector<8x384xf32>
    %cst_29 = arith.constant 1.000000e+00 : f32
    %143 = vector.broadcast %cst_29 : f32 to vector<8x384xf32>
    %144 = arith.addf %143, %142 : vector<8x384xf32>
    %145 = arith.divf %143, %144 : vector<8x384xf32>
    %146 = vector.extract_strided_slice %139 {offsets = [0, 384], sizes = [8, 128], strides = [1, 1]} : vector<8x512xf32> to vector<8x128xf32>
    %147 = math.tanh %146 : vector<8x128xf32>
    %148 = vector.extract_strided_slice %145 {offsets = [0, 0], sizes = [8, 128], strides = [1, 1]} : vector<8x384xf32> to vector<8x128xf32>
    %149 = vector.extract_strided_slice %145 {offsets = [0, 128], sizes = [8, 128], strides = [1, 1]} : vector<8x384xf32> to vector<8x128xf32>
    %150 = vector.extract_strided_slice %145 {offsets = [0, 256], sizes = [8, 128], strides = [1, 1]} : vector<8x384xf32> to vector<8x128xf32>
    %151 = arith.mulf %149, %127 : vector<8x128xf32>
    %152 = arith.mulf %148, %147 : vector<8x128xf32>
    %153 = arith.addf %151, %152 : vector<8x128xf32>
    %154 = math.tanh %153 : vector<8x128xf32>
    %155 = arith.mulf %150, %154 : vector<8x128xf32>
    %c5_i32 = arith.constant 5 : i32
    %156 = vector.broadcast %c5_i32 : i32 to vector<8x1xi32>
    %157 = arith.cmpi eq, %1, %156 : vector<8x1xi32>
    %158 = vector.shape_cast %157 : vector<8x1xi1> to vector<8x1xi1>
    %159 = vector.broadcast %158 : vector<8x1xi1> to vector<8x128xi1>
    %160 = arith.select %159, %155, %134 : vector<8x128xi1>, vector<8x128xf32>
    %c6 = arith.constant 6 : index
    %c0_30 = arith.constant 0 : index
    %c0_31 = arith.constant 0 : index
    %161 = vector.load %arg0[%c6, %c0_30, %c0_31] : memref<8x8x512xf32, #tpu.memory_space<vmem>>, vector<1x8x512xf32>
    %162 = vector.shape_cast %161 : vector<1x8x512xf32> to vector<8x512xf32>
    %163 = arith.truncf %155 : vector<8x128xf32> to vector<8x128xbf16>
    %cst_32 = arith.constant dense<0.000000e+00> : vector<8x512xf32>
    %164 = tpu.matmul %163, %0, %cst_32 {dimension_numbers = #tpu.dot_dimension_numbers<[1], [0], [0], [1], [0, 0, 1, 1], [], []>} : vector<8x128xbf16>, vector<128x512xbf16>, vector<8x512xf32> -> vector<8x512xf32>
    %165 = arith.addf %162, %164 : vector<8x512xf32>
    %166 = vector.extract_strided_slice %165 {offsets = [0, 0], sizes = [8, 384], strides = [1, 1]} : vector<8x512xf32> to vector<8x384xf32>
    %167 = arith.negf %166 : vector<8x384xf32>
    %168 = math.exp %167 : vector<8x384xf32>
    %cst_33 = arith.constant 1.000000e+00 : f32
    %169 = vector.broadcast %cst_33 : f32 to vector<8x384xf32>
    %170 = arith.addf %169, %168 : vector<8x384xf32>
    %171 = arith.divf %169, %170 : vector<8x384xf32>
    %172 = vector.extract_strided_slice %165 {offsets = [0, 384], sizes = [8, 128], strides = [1, 1]} : vector<8x512xf32> to vector<8x128xf32>
    %173 = math.tanh %172 : vector<8x128xf32>
    %174 = vector.extract_strided_slice %171 {offsets = [0, 0], sizes = [8, 128], strides = [1, 1]} : vector<8x384xf32> to vector<8x128xf32>
    %175 = vector.extract_strided_slice %171 {offsets = [0, 128], sizes = [8, 128], strides = [1, 1]} : vector<8x384xf32> to vector<8x128xf32>
    %176 = vector.extract_strided_slice %171 {offsets = [0, 256], sizes = [8, 128], strides = [1, 1]} : vector<8x384xf32> to vector<8x128xf32>
    %177 = arith.mulf %175, %153 : vector<8x128xf32>
    %178 = arith.mulf %174, %173 : vector<8x128xf32>
    %179 = arith.addf %177, %178 : vector<8x128xf32>
    %180 = math.tanh %179 : vector<8x128xf32>
    %181 = arith.mulf %176, %180 : vector<8x128xf32>
    %c6_i32 = arith.constant 6 : i32
    %182 = vector.broadcast %c6_i32 : i32 to vector<8x1xi32>
    %183 = arith.cmpi eq, %1, %182 : vector<8x1xi32>
    %184 = vector.shape_cast %183 : vector<8x1xi1> to vector<8x1xi1>
    %185 = vector.broadcast %184 : vector<8x1xi1> to vector<8x128xi1>
    %186 = arith.select %185, %181, %160 : vector<8x128xi1>, vector<8x128xf32>
    %c7 = arith.constant 7 : index
    %c0_34 = arith.constant 0 : index
    %c0_35 = arith.constant 0 : index
    %187 = vector.load %arg0[%c7, %c0_34, %c0_35] : memref<8x8x512xf32, #tpu.memory_space<vmem>>, vector<1x8x512xf32>
    %188 = vector.shape_cast %187 : vector<1x8x512xf32> to vector<8x512xf32>
    %189 = arith.truncf %181 : vector<8x128xf32> to vector<8x128xbf16>
    %cst_36 = arith.constant dense<0.000000e+00> : vector<8x512xf32>
    %190 = tpu.matmul %189, %0, %cst_36 {dimension_numbers = #tpu.dot_dimension_numbers<[1], [0], [0], [1], [0, 0, 1, 1], [], []>} : vector<8x128xbf16>, vector<128x512xbf16>, vector<8x512xf32> -> vector<8x512xf32>
    %191 = arith.addf %188, %190 : vector<8x512xf32>
    %192 = vector.extract_strided_slice %191 {offsets = [0, 0], sizes = [8, 384], strides = [1, 1]} : vector<8x512xf32> to vector<8x384xf32>
    %193 = arith.negf %192 : vector<8x384xf32>
    %194 = math.exp %193 : vector<8x384xf32>
    %cst_37 = arith.constant 1.000000e+00 : f32
    %195 = vector.broadcast %cst_37 : f32 to vector<8x384xf32>
    %196 = arith.addf %195, %194 : vector<8x384xf32>
    %197 = arith.divf %195, %196 : vector<8x384xf32>
    %198 = vector.extract_strided_slice %191 {offsets = [0, 384], sizes = [8, 128], strides = [1, 1]} : vector<8x512xf32> to vector<8x128xf32>
    %199 = math.tanh %198 : vector<8x128xf32>
    %200 = vector.extract_strided_slice %197 {offsets = [0, 0], sizes = [8, 128], strides = [1, 1]} : vector<8x384xf32> to vector<8x128xf32>
    %201 = vector.extract_strided_slice %197 {offsets = [0, 128], sizes = [8, 128], strides = [1, 1]} : vector<8x384xf32> to vector<8x128xf32>
    %202 = vector.extract_strided_slice %197 {offsets = [0, 256], sizes = [8, 128], strides = [1, 1]} : vector<8x384xf32> to vector<8x128xf32>
    %203 = arith.mulf %201, %179 : vector<8x128xf32>
    %204 = arith.mulf %200, %199 : vector<8x128xf32>
    %205 = arith.addf %203, %204 : vector<8x128xf32>
    %206 = math.tanh %205 : vector<8x128xf32>
    %207 = arith.mulf %202, %206 : vector<8x128xf32>
    %c7_i32 = arith.constant 7 : i32
    %208 = vector.broadcast %c7_i32 : i32 to vector<8x1xi32>
    %209 = arith.cmpi eq, %1, %208 : vector<8x1xi32>
    %210 = vector.shape_cast %209 : vector<8x1xi1> to vector<8x1xi1>
    %211 = vector.broadcast %210 : vector<8x1xi1> to vector<8x128xi1>
    %212 = arith.select %211, %207, %186 : vector<8x128xi1>, vector<8x128xf32>
    %c0_38 = arith.constant 0 : index
    %c0_39 = arith.constant 0 : index
    %213 = vector.load %arg3[%c0_38, %c0_39] : memref<1x128xf32, #tpu.memory_space<vmem>>, vector<1x128xf32>
    %214 = vector.broadcast %213 : vector<1x128xf32> to vector<8x128xf32>
    %215 = arith.mulf %212, %214 : vector<8x128xf32>
    %cst_40 = arith.constant dense<0.000000e+00> : vector<8xf32>
    %216 = vector.multi_reduction <add>, %215, %cst_40 [1] : vector<8x128xf32> to vector<8xf32>
    %217 = vector.shape_cast %216 : vector<8xf32> to vector<8x1xf32>
    %c0_41 = arith.constant 0 : index
    %c0_42 = arith.constant 0 : index
    %218 = vector.load %arg4[%c0_41, %c0_42] : memref<1x1xf32, #tpu.memory_space<vmem>>, vector<1x1xf32>
    %219 = vector.broadcast %218 : vector<1x1xf32> to vector<8x1xf32>
    %220 = arith.addf %217, %219 : vector<8x1xf32>
    %c0_43 = arith.constant 0 : index
    %c0_44 = arith.constant 0 : index
    %221 = vector.load %arg5[%c0_43, %c0_44] : memref<8x1xf32, #tpu.memory_space<vmem>>, vector<8x1xf32>
    tpu.vector_store %arg5[%c0_43, %c0_44], %220 {strides = array<i32>} : memref<8x1xf32, #tpu.memory_space<vmem>>, vector<8x1xf32>,
    return
  }
}

</mosaic_0001>

<bundles_post_ra>
// kernel: tpu_custom_call.1
= control target key start
LH: loop header
LB: loop body
LE: loop exit
PB: predicated region body
PF: predicated region fallthrough
CT: control target
= control target key end

     0   :  { %s2155_s0 = inlined_call_operand.hbm [shape: f32[8,8,512], index: 0, kind: input, shape index: {}]   ;;  %s2156_s1 = inlined_call_operand.vmem [shape: s32[8,1], index: 1, kind: input, shape index: {}]   ;;  %s2157_s2 = inlined_call_operand.hbm [shape: bf16[128,512], index: 2, kind: input, shape index: {}]   ;;  %s2158_s3 = inlined_call_operand.vmem [shape: f32[1,128], index: 3, kind: input, shape index: {}]   ;;  %s2159_s4 = inlined_call_operand.<no memory space> [shape: f32[1,1], index: 4, kind: input, shape index: {}]   ;;  %s2160_s5 = inlined_call_operand.vmem [shape: f32[8,1], index: 5, kind: output, shape index: {}]  }
   0x1   :  { %v10_v0 = vstv %s2159_s4 }
   0x2   :  { %11 = vst [vmem:[#allocation2] sm:$0x1] %v10_v0 }
   0x3   :  { %12 = vsyncpa [#allocation4], 0  ;;  %s18_s22 = sshll.u32 %s2155_s0, 4  ;;  %s19_s22 = int_to_ptr.hbm [resolvable:$true] %s18_s22 }
   0x4   :  { %13 = vsyncpa [#allocation6], 0  ;;  %s1699_s23 = smov [#allocation3]   ;;  %s33_s27 = sshll.u32 %s2157_s2, 4  ;;  %s34_s27 = int_to_ptr.hbm [resolvable:$true] %s33_s27 }
   0x5   :  { %s20_s24 = sshll.u32 %s1699_s23, 4  ;;  %s1700_s28 = smov 512   ;;  %s21_s24 = int_to_ptr.vmem [resolvable:$true] %s20_s24 }
   0x6   :  { %s1701_s29 = smov 32   ;;  %s1702_s4 = smov [#allocation5]  }
   0x7   :  { %26 = dma.hbm_to_vmem [thread:$0]  %s19_s22, 4096, %s21_s24, [#allocation4], %s1700_s28, %s1700_s28, %s1701_s29  }
   0x8   :  { %s35_s30 = sshll.u32 %s1702_s4, 4  ;;  %s1703_s6 = smov 256   ;;  %s36_s30 = int_to_ptr.vmem [resolvable:$true] %s35_s30 }
   0x9   :  { %s1704_s7 = smov 16  }
   0xa   :  { %41 = dma.hbm_to_vmem [thread:$0]  %s34_s27, 4096, %s36_s30, [#allocation6], %s1703_s6, %s1703_s6, %s1704_s7  }
   0xb   :  { %1695 = dma.done.wait [#allocation4], 4096  }
   0xc   :  { %1696 = vsyncadd [#allocation4], 4294963200 }
   0xd   :  { %1697 = dma.done.wait [#allocation6], 4096  }
   0xe   :  { %1698 = vsyncadd [#allocation6], 4294963200  ;;  %v1436_v1 = vld [vmem:[#allocation5 + $0xe0] sm:$0xf]  ;;  %v1504_v2 = vld [vmem:[#allocation5 + $0xec] sm:$0xf0] }
   0xf   :  { %v1502_v3 = vld [vmem:[#allocation5 + $0xe4] sm:$0xf]  ;;  %v1745_v4 = vor.u32 %v1504_v2, %v1436_v1  ;;  %v1438_v5 = vld [vmem:[#allocation5 + $0xf0] sm:$0xf0]  ;;  %v1444_v6 = vld [vmem:[#allocation5 + $0xe8] sm:$0xf] }
  0x10   :  { %v1505_v7 = vld [vmem:[#allocation5 + $0xf4] sm:$0xf0]  ;;  %v1747_v8 = vor.u32 %v1502_v3, %v1438_v5  ;;  %v1420_v10 = vld [vmem:[#allocation5 + $0xc0] sm:$0xf]  ;;  %v1500_v11 = vld [vmem:[#allocation5 + $0xcc] sm:$0xf0] }
  0x11   :  { %v1749_v9 = vor.u32 %v1505_v7, %v1444_v6  ;;  %v1498_v12 = vld [vmem:[#allocation5 + $0xc4] sm:$0xf]  ;;  %252 = vmatpush.bf16.msra.mxu0 %v1745_v4  ;;  %v1752_v13 = vor.u32 %v1500_v11, %v1420_v10  ;;  %v1422_v14 = vld [vmem:[#allocation5 + $0xd0] sm:$0xf0]  ;;  %v1428_v15 = vld [vmem:[#allocation5 + $0xc8] sm:$0xf] }
  0x12   :  { %v1501_v16 = vld [vmem:[#allocation5 + $0xd4] sm:$0xf0]  ;;  %265 = vmatpush.bf16.msra.mxu1 %v1747_v8  ;;  %v1756_v17 = vor.u32 %v1498_v12, %v1422_v14  ;;  %v1503_v19 = vld [vmem:[#allocation5 + $0xec] sm:$0xf]  ;;  %v1446_v20 = vld [vmem:[#allocation5 + $0xf8] sm:$0xf0] }
  0x13   :  { %278 = vmatpush.bf16.msra.mxu2 %v1749_v9  ;;  %v1758_v18 = vor.u32 %v1501_v16, %v1428_v15  ;;  %v1404_v21 = vld [vmem:[#allocation5 + $0xa0] sm:$0xf]  ;;  %v1760_v22 = vor.u32 %v1503_v19, %v1446_v20  ;;  %v1496_v23 = vld [vmem:[#allocation5 + $0xac] sm:$0xf0]  ;;  %v1494_v24 = vld [vmem:[#allocation5 + $0xa4] sm:$0xf] }
  0x14   :  { %v1406_v25 = vld [vmem:[#allocation5 + $0xb0] sm:$0xf0]  ;;  %v1412_v26 = vld [vmem:[#allocation5 + $0xa8] sm:$0xf]  ;;  %v1497_v27 = vld [vmem:[#allocation5 + $0xb4] sm:$0xf0]  ;;  %v1764_v29 = vor.u32 %v1496_v23, %v1404_v21 }
  0x15   :  { %v1499_v28 = vld [vmem:[#allocation5 + $0xcc] sm:$0xf]  ;;  %253 = vmatpush.bf16.msra.mxu0 %v1752_v13  ;;  %291 = vmatpush.bf16.msra.mxu3 %v1760_v22  ;;  %v1430_v30 = vld [vmem:[#allocation5 + $0xd8] sm:$0xf0]  ;;  %v1388_v31 = vld [vmem:[#allocation5 + $0x80] sm:$0xf]  ;;  %v1768_v33 = vor.u32 %v1494_v24, %v1406_v25  ;;  %v1770_v34 = vor.u32 %v1497_v27, %v1412_v26 }
  0x16   :  { %v1492_v32 = vld [vmem:[#allocation5 + $0x8c] sm:$0xf0]  ;;  %266 = vmatpush.bf16.msra.mxu1 %v1756_v17  ;;  %v1772_v35 = vor.u32 %v1499_v28, %v1430_v30  ;;  %v1490_v36 = vld [vmem:[#allocation5 + $0x84] sm:$0xf]  ;;  %v1390_v37 = vld [vmem:[#allocation5 + $0x90] sm:$0xf0] }
  0x17   :  { %279 = vmatpush.bf16.msra.mxu2 %v1758_v18  ;;  %v1396_v38 = vld [vmem:[#allocation5 + $0x88] sm:$0xf]  ;;  %v1493_v39 = vld [vmem:[#allocation5 + $0x94] sm:$0xf0]  ;;  %v1495_v40 = vld [vmem:[#allocation5 + $0xac] sm:$0xf]  ;;  %v1776_v42 = vor.u32 %v1492_v32, %v1388_v31  ;;  %v1782_v46 = vor.u32 %v1490_v36, %v1390_v37 }
  0x18   :  { %v1414_v41 = vld [vmem:[#allocation5 + $0xb8] sm:$0xf0]  ;;  %v1372_v44 = vld [vmem:[#allocation5 + $0x60] sm:$0xf]  ;;  %v1488_v45 = vld [vmem:[#allocation5 + $0x6c] sm:$0xf0]  ;;  %v1784_v47 = vor.u32 %v1493_v39, %v1396_v38 }
  0x19   :  { %254 = vmatpush.bf16.msra.mxu0 %v1764_v29  ;;  %292 = vmatpush.bf16.msra.mxu3 %v1772_v35  ;;  %v1778_v43 = vor.u32 %v1495_v40, %v1414_v41  ;;  %v1486_v48 = vld [vmem:[#allocation5 + $0x64] sm:$0xf]  ;;  %v1491_v49 = vld [vmem:[#allocation5 + $0x8c] sm:$0xf]  ;;  %v1398_v50 = vld [vmem:[#allocation5 + $0x98] sm:$0xf0]  ;;  %v1788_v54 = vor.u32 %v1488_v45, %v1372_v44 }
  0x1a   :  { %267 = vmatpush.bf16.msra.mxu1 %v1768_v33  ;;  %v1374_v51 = vld [vmem:[#allocation5 + $0x70] sm:$0xf0]  ;;  %v1380_v52 = vld [vmem:[#allocation5 + $0x68] sm:$0xf]  ;;  %v1489_v53 = vld [vmem:[#allocation5 + $0x74] sm:$0xf0]  ;;  %v1790_v55 = vor.u32 %v1491_v49, %v1398_v50 }
  0x1b   :  { %280 = vmatpush.bf16.msra.mxu2 %v1770_v34  ;;  %v1356_v56 = vld [vmem:[#allocation5 + $0x40] sm:$0xf]  ;;  %v1484_v57 = vld [vmem:[#allocation5 + $0x4c] sm:$0xf0]  ;;  %v1794_v58 = vor.u32 %v1486_v48, %v1374_v51  ;;  %v1796_v59 = vor.u32 %v1489_v53, %v1380_v52  ;;  %v1482_v60 = vld [vmem:[#allocation5 + $0x44] sm:$0xf] }
  0x1c   :  { %v1487_v61 = vld [vmem:[#allocation5 + $0x6c] sm:$0xf]  ;;  %v1382_v62 = vld [vmem:[#allocation5 + $0x78] sm:$0xf0]  ;;  %v1358_v63 = vld [vmem:[#allocation5 + $0x50] sm:$0xf0]  ;;  %v1800_v3 = vor.u32 %v1484_v57, %v1356_v56 }
  0x1d   :  { %255 = vmatpush.bf16.msra.mxu0 %v1776_v42  ;;  %293 = vmatpush.bf16.msra.mxu3 %v1778_v43  ;;  %v1364_v0 = vld [vmem:[#allocation5 + $0x48] sm:$0xf]  ;;  %v1485_v1 = vld [vmem:[#allocation5 + $0x54] sm:$0xf0]  ;;  %v1340_v2 = vld [vmem:[#allocation5 + $0x20] sm:$0xf]  ;;  %v1802_v5 = vor.u32 %v1487_v61, %v1382_v62  ;;  %v1806_v11 = vor.u32 %v1482_v60, %v1358_v63 }
  0x1e   :  { %268 = vmatpush.bf16.msra.mxu1 %v1782_v46  ;;  %v1480_v6 = vld [vmem:[#allocation5 + $0x2c] sm:$0xf0]  ;;  %v1478_v7 = vld [vmem:[#allocation5 + $0x24] sm:$0xf]  ;;  %v1342_v10 = vld [vmem:[#allocation5 + $0x30] sm:$0xf0]  ;;  %v1808_v12 = vor.u32 %v1485_v1, %v1364_v0 }
  0x1f   :  { %281 = vmatpush.bf16.msra.mxu2 %v1784_v47  ;;  %v1483_v14 = vld [vmem:[#allocation5 + $0x4c] sm:$0xf]  ;;  %v1366_v15 = vld [vmem:[#allocation5 + $0x58] sm:$0xf0]  ;;  %v1348_v19 = vld [vmem:[#allocation5 + $0x28] sm:$0xf]  ;;  %v1822_v24 = vor.u32 %v1480_v6, %v1340_v2  ;;  %v1828_v28 = vor.u32 %v1478_v7, %v1342_v10 }
  0x20   :  { %v1813_v16 = vld [vmem:[%s2156_s1] sm:$0xff]  ;;  %v1481_v20 = vld [vmem:[#allocation5 + $0x34] sm:$0xf0]  ;;  %v1705_v21 = vmov 0   ;;  %v1824_v25 = vor.u32 %v1483_v14, %v1366_v15  ;;  %v1476_v27 = vld [vmem:[#allocation5 + $0xc] sm:$0xf0] }
  0x21   :  { %256 = vmatpush.bf16.msra.mxu0 %v1788_v54  ;;  %294 = vmatpush.bf16.msra.mxu3 %v1790_v55  ;;  %vm371_vm0 = vcmp.eq.s32.totalorder %v1813_v16, 0  ;;  %v1324_v26 = vld [vmem:[#allocation5] sm:$0xf]  ;;  %v1830_v30 = vor.u32 %v1481_v20, %v1348_v19  ;;  %v1474_v31 = vld [vmem:[#allocation5 + $0x4] sm:$0xf]  ;;  %v89_v52 = vld [vmem:[#allocation3 + $0x8] sm:$0xff] }
  0x22   :  { %269 = vmatpush.bf16.msra.mxu1 %v1794_v58  ;;  %1513 = vset.pattern.permute.xlu0 %v1705_v21  ;;  %v372_v23 = vsel %vm371_vm0, 1, %v1705_v21  ;;  %v1479_v32 = vld [vmem:[#allocation5 + $0x2c] sm:$0xf]  ;;  %v1350_v36 = vld [vmem:[#allocation5 + $0x38] sm:$0xf0]  ;;  %v1834_v40 = vor.u32 %v1476_v27, %v1324_v26  ;;  %v88_v51 = vld [vmem:[#allocation3] sm:$0xff] }
  0x23   :  { %282 = vmatpush.bf16.msra.mxu2 %v1796_v59  ;;  %1514 = vset.pattern.permute.xlu1 %v1705_v21  ;;  %v1326_v37 = vld [vmem:[#allocation5 + $0x10] sm:$0xf0]  ;;  %v1332_v38 = vld [vmem:[#allocation5 + $0x8] sm:$0xf]  ;;  %v1477_v39 = vld [vmem:[#allocation5 + $0x14] sm:$0xf0]  ;;  %v1836_v41 = vor.u32 %v1479_v32, %v1350_v36 }
  0x24   :  { %1515 = vset.pattern.permute.xlu2 %v1705_v21  ;;  %374 = vperm.xlu0 %1513, %v372_v23   ;;  %v1840_v44 = vor.u32 %v1474_v31, %v1326_v37  ;;  %v1842_v45 = vor.u32 %v1477_v39, %v1332_v38  ;;  %v1475_v48 = vld [vmem:[#allocation5 + $0xc] sm:$0xf]  ;;  %v1334_v49 = vld [vmem:[#allocation5 + $0x18] sm:$0xf0]  ;;  %v90_v63 = vld [vmem:[#allocation3 + $0x10] sm:$0xff]  ;;  %vm503_vm1 = vcmp.eq.s32.totalorder %v1813_v16, 1 }
  0x25   :  { %257 = vmatpush.bf16.msra.mxu0 %v1800_v3  ;;  %295 = vmatpush.bf16.msra.mxu3 %v1802_v5  ;;  %v1848_v50 = vor.u32 %v1475_v48, %v1334_v49  ;;  %v91_v23 = vld [vmem:[#allocation3 + $0x18] sm:$0xff]  ;;  %v504_v27 = vsel %vm503_vm1, 1, %v1705_v21  ;;  %vm635_vm14 = vcmp.eq.s32.totalorder %v1813_v16, 2 }
  0x26   :  { %270 = vmatpush.bf16.msra.mxu1 %v1806_v11 }
  0x27   :  { %283 = vmatpush.bf16.msra.mxu2 %v1808_v12 }
  0x29   :  { %258 = vmatpush.bf16.msra.mxu0 %v1822_v24  ;;  %296 = vmatpush.bf16.msra.mxu3 %v1824_v25 }
  0x2a   :  { %271 = vmatpush.bf16.msra.mxu1 %v1828_v28 }
  0x2b   :  { %284 = vmatpush.bf16.msra.mxu2 %v1830_v30 }
  0x2c   :  { %506 = vperm.xlu0 %1513, %v504_v27  }
  0x2d   :  { %259 = vmatpush.bf16.msra.mxu0 %v1834_v40  ;;  %297 = vmatpush.bf16.msra.mxu3 %v1836_v41 }
  0x2e   :  { %272 = vmatpush.bf16.msra.mxu1 %v1840_v44 }
  0x2f   :  { %285 = vmatpush.bf16.msra.mxu2 %v1842_v45 }
  0x30   :  { %260 = vmatmul.bf16.vlgmr.msra.gmra.mxu0 %v1705_v21 }
  0x31   :  { %384 = vmatpush.bf16.msrb.mxu0 %v1745_v4  ;;  %273 = vmatmul.bf16.vlgmr.msra.gmra.mxu1 %v1705_v21 }
  0x32   :  { %397 = vmatpush.bf16.msrb.mxu1 %v1747_v8  ;;  %286 = vmatmul.bf16.vlgmr.msra.gmra.mxu2 %v1705_v21 }
  0x33   :  { %410 = vmatpush.bf16.msrb.mxu2 %v1749_v9  ;;  %298 = vmatpush.bf16.msra.mxu3 %v1848_v50 }
  0x35   :  { %385 = vmatpush.bf16.msrb.mxu0 %v1752_v13 }
  0x36   :  { %398 = vmatpush.bf16.msrb.mxu1 %v1756_v17  ;;  %299 = vmatmul.bf16.vlgmr.msra.gmra.mxu3 %v1705_v21 }
  0x37   :  { %423 = vmatpush.bf16.msrb.mxu3 %v1760_v22  ;;  %411 = vmatpush.bf16.msrb.mxu2 %v1758_v18 }
  0x39   :  { %386 = vmatpush.bf16.msrb.mxu0 %v1764_v29 }
  0x3a   :  { %399 = vmatpush.bf16.msrb.mxu1 %v1768_v33 }
  0x3b   :  { %424 = vmatpush.bf16.msrb.mxu3 %v1772_v35  ;;  %412 = vmatpush.bf16.msrb.mxu2 %v1770_v34 }
  0x3d   :  { %387 = vmatpush.bf16.msrb.mxu0 %v1776_v42 }
  0x3e   :  { %400 = vmatpush.bf16.msrb.mxu1 %v1782_v46 }
  0x3f   :  { %425 = vmatpush.bf16.msrb.mxu3 %v1778_v43  ;;  %413 = vmatpush.bf16.msrb.mxu2 %v1784_v47 }
  0x41   :  { %388 = vmatpush.bf16.msrb.mxu0 %v1788_v54 }
  0x42   :  { %401 = vmatpush.bf16.msrb.mxu1 %v1794_v58 }
  0x43   :  { %426 = vmatpush.bf16.msrb.mxu3 %v1790_v55  ;;  %414 = vmatpush.bf16.msrb.mxu2 %v1796_v59 }
  0x45   :  { %389 = vmatpush.bf16.msrb.mxu0 %v1800_v3 }
  0x46   :  { %402 = vmatpush.bf16.msrb.mxu1 %v1806_v11 }
  0x47   :  { %427 = vmatpush.bf16.msrb.mxu3 %v1802_v5  ;;  %415 = vmatpush.bf16.msrb.mxu2 %v1808_v12 }
  0x49   :  { %390 = vmatpush.bf16.msrb.mxu0 %v1822_v24 }
  0x4a   :  { %403 = vmatpush.bf16.msrb.mxu1 %v1828_v28 }
  0x4b   :  { %428 = vmatpush.bf16.msrb.mxu3 %v1824_v25  ;;  %416 = vmatpush.bf16.msrb.mxu2 %v1830_v30 }
  0x4d   :  { %391 = vmatpush.bf16.msrb.mxu0 %v1834_v40 }
  0x4e   :  { %404 = vmatpush.bf16.msrb.mxu1 %v1840_v44 }
  0x4f   :  { %429 = vmatpush.bf16.msrb.mxu3 %v1836_v41  ;;  %417 = vmatpush.bf16.msrb.mxu2 %v1842_v45 }
  0x51   :  { %516 = vmatpush.bf16.msra.mxu0 %v1745_v4 }
  0x52   :  { %529 = vmatpush.bf16.msra.mxu1 %v1747_v8 }
  0x53   :  { %542 = vmatpush.bf16.msra.mxu2 %v1749_v9  ;;  %430 = vmatpush.bf16.msrb.mxu3 %v1848_v50 }
  0x55   :  { %517 = vmatpush.bf16.msra.mxu0 %v1752_v13 }
  0x56   :  { %530 = vmatpush.bf16.msra.mxu1 %v1756_v17 }
  0x57   :  { %555 = vmatpush.bf16.msra.mxu3 %v1760_v22  ;;  %543 = vmatpush.bf16.msra.mxu2 %v1758_v18 }
  0x59   :  { %518 = vmatpush.bf16.msra.mxu0 %v1764_v29 }
  0x5a   :  { %531 = vmatpush.bf16.msra.mxu1 %v1768_v33 }
  0x5b   :  { %556 = vmatpush.bf16.msra.mxu3 %v1772_v35  ;;  %544 = vmatpush.bf16.msra.mxu2 %v1770_v34 }
  0x5d   :  { %519 = vmatpush.bf16.msra.mxu0 %v1776_v42 }
  0x5e   :  { %532 = vmatpush.bf16.msra.mxu1 %v1782_v46 }
  0x5f   :  { %557 = vmatpush.bf16.msra.mxu3 %v1778_v43  ;;  %545 = vmatpush.bf16.msra.mxu2 %v1784_v47 }
  0x61   :  { %520 = vmatpush.bf16.msra.mxu0 %v1788_v54 }
  0x62   :  { %533 = vmatpush.bf16.msra.mxu1 %v1794_v58 }
  0x63   :  { %558 = vmatpush.bf16.msra.mxu3 %v1790_v55  ;;  %546 = vmatpush.bf16.msra.mxu2 %v1796_v59 }
  0x65   :  { %521 = vmatpush.bf16.msra.mxu0 %v1800_v3 }
  0x66   :  { %534 = vmatpush.bf16.msra.mxu1 %v1806_v11 }
  0x67   :  { %559 = vmatpush.bf16.msra.mxu3 %v1802_v5  ;;  %547 = vmatpush.bf16.msra.mxu2 %v1808_v12 }
  0x69   :  { %522 = vmatpush.bf16.msra.mxu0 %v1822_v24 }
  0x6a   :  { %535 = vmatpush.bf16.msra.mxu1 %v1828_v28 }
  0x6b   :  { %560 = vmatpush.bf16.msra.mxu3 %v1824_v25  ;;  %548 = vmatpush.bf16.msra.mxu2 %v1830_v30 }
  0x6d   :  { %523 = vmatpush.bf16.msra.mxu0 %v1834_v40 }
  0x6e   :  { %536 = vmatpush.bf16.msra.mxu1 %v1840_v44 }
  0x6f   :  { %561 = vmatpush.bf16.msra.mxu3 %v1836_v41  ;;  %549 = vmatpush.bf16.msra.mxu2 %v1842_v45 }
  0x73   :  { %562 = vmatpush.bf16.msra.mxu3 %v1848_v50 }
  0xad   :  { %v261_v53 = vpop.f32.mrf.mxu0 }
  0xae   :  { %v304_v56 = vadd.f32 %v261_v53, %v88_v51  ;;  %v274_v57 = vpop.f32.mrf.mxu1 }
  0xaf   :  { %v305_v60 = vadd.f32 %v274_v57, %v89_v52 }
  0xb0   :  { %v1450_v61 = vmul.f32 -1.442695, %v304_v56 }
  0xb1   :  { %v1451_v62 = vmul.f32 -1.442695, %v305_v60 }
  0xb2   :  { %1518 = vpow2.f32 %v1450_v61 }
  0xb3   :  { %1520 = vpow2.f32 %v1451_v62 }
  0xb5   :  { %v287_v0 = vpop.f32.mrf.mxu2  ;;  %v263_v2 = vpop.f32.mrf.mxu0 }
  0xb6   :  { %v306_v1 = vadd.f32 %v287_v0, %v90_v63  ;;  %v276_v6 = vpop.f32.mrf.mxu1 }
  0xb8   :  { %v1452_v7 = vmul.f32 -1.442695, %v306_v1  ;;  %v1519_v10 = vpop.eup %1518 }
  0xb9   :  { %v300_v14 = vpop.f32.mrf.mxu3  ;;  %v1521_v15 = vpop.eup %1520  ;;  %v317_v19 = vadd.f32 1.0, %v1519_v10 }
  0xba   :  { %1522 = vpow2.f32 %v1452_v7  ;;  %v318_v20 = vadd.f32 1.0, %v1521_v15  ;;  %v307_v32 = vadd.f32 %v300_v14, %v91_v23 }
  0xbb   :  { %1524 = vrcp.f32 %v317_v19  ;;  %v331_v53 = vand.u32 2147483648, %v317_v19  ;;  %v329_v60 = vand.u32 2147483647, %v317_v19  ;;  %vm325_vm4 = vweird.f32 %v317_v19 }
  0xbc   :  { %1526 = vrcp.f32 %v318_v20  ;;  %v346_v56 = vand.u32 2147483648, %v318_v20  ;;  %v344_v62 = vand.u32 2147483647, %v318_v20  ;;  %vm340_vm5 = vweird.f32 %v318_v20 }
  0xbd   :  { %v289_v26 = vpop.f32.mrf.mxu2  ;;  %v332_v2 = vor.u32 1.1754944e-38, %v331_v53  ;;  %vm330_vm7 = vcmp.eq.f32.partialorder %v329_v60, 8.507059e+37 }
  0xbe   :  { %v347_v10 = vor.u32 1.1754944e-38, %v346_v56  ;;  %vm345_vm9 = vcmp.eq.f32.partialorder %v344_v62, 8.507059e+37 }
  0xc0   :  { %v1523_v31 = vpop.eup %1522 }
  0xc1   :  { %v319_v36 = vadd.f32 1.0, %v1523_v31  ;;  %v302_v37 = vpop.f32.mrf.mxu3  ;;  %v1525_v38 = vpop.eup %1524 }
  0xc2   :  { %v1527_v39 = vpop.eup %1526  ;;  %v321_v48 = vmul.f32 %v1525_v38, %v317_v19  ;;  %vm326_vm2 = vweird.f32 %v1525_v38 }
  0xc3   :  { %1528 = vrcp.f32 %v319_v36  ;;  %v336_v49 = vmul.f32 %v1527_v39, %v318_v20  ;;  %vm341_vm3 = vweird.f32 %v1527_v39  ;;  %vm327_vm6 = vmor %vm325_vm4, %vm326_vm2  ;;  %v361_v20 = vand.u32 2147483648, %v319_v36 }
  0xc4   :  { %1530 = vtanh.f32 %v307_v32  ;;  %v322_v51 = vsub.f32 1.0, %v321_v48  ;;  %vm342_vm8 = vmor %vm340_vm5, %vm341_vm3  ;;  %vm355_vm11 = vweird.f32 %v319_v36 }
  0xc5   :  { %v337_v52 = vsub.f32 1.0, %v336_v49  ;;  %v359_v49 = vand.u32 2147483647, %v319_v36 }
  0xc6   :  { %v323_v57 = vmul.f32 %v1525_v38, %v322_v51  ;;  %v362_v51 = vor.u32 1.1754944e-38, %v361_v20  ;;  %v382_v20 = vld [vmem:[#allocation3 + $0x38] sm:$0xff] }
  0xc7   :  { %v338_v61 = vmul.f32 %v1527_v39, %v337_v52  ;;  %vm360_vm13 = vcmp.eq.f32.partialorder %v359_v49, 8.507059e+37  ;;  %v636_v49 = vsel %vm635_vm14, 1, %v1705_v21 }
  0xc8   :  { %v324_v0 = vadd.f32 %v1525_v38, %v323_v57  ;;  %v380_v57 = vld [vmem:[#allocation3 + $0x28] sm:$0xff]  ;;  %638 = vperm.xlu1 %1514, %v636_v49  }
  0xc9   :  { %v1529_v63 = vpop.eup %1528  ;;  %v339_v6 = vadd.f32 %v1527_v39, %v338_v61 }
  0xca   :  { %v1531_v1 = vpop.eup %1530  ;;  %v351_v7 = vmul.f32 %v1529_v63, %v319_v36  ;;  %v328_v14 = vsel %vm327_vm6, %v1525_v38, %v324_v0  ;;  %vm356_vm10 = vweird.f32 %v1529_v63  ;;  %v379_v36 = vld [vmem:[#allocation3 + $0x20] sm:$0xff] }
  0xcb   :  { %v333_v15 = vsel %vm330_vm7, %v332_v2, %v328_v14  ;;  %v343_v23 = vsel %vm342_vm8, %v1527_v39, %v339_v6  ;;  %vm357_vm12 = vmor %vm355_vm11, %vm356_vm10  ;;  %v381_v2 = vld [vmem:[#allocation3 + $0x30] sm:$0xff] }
  0xcc   :  { %v352_v26 = vsub.f32 1.0, %v351_v7  ;;  %v348_v27 = vsel %vm345_vm9, %v347_v10, %v343_v23  ;;  %v367_v31 = vmul.f32 %v1531_v1, %v333_v15 }
  0xcd   :  { %v366_v32 = vmul.f32 0.0, %v348_v27 }
  0xce   :  { %v353_v37 = vmul.f32 %v1529_v63, %v352_v26 }
  0xcf   :  { %v1921_v48 = vadd.f32 %v367_v31, %v366_v32 }
  0xd0   :  { %v354_v19 = vadd.f32 %v1529_v63, %v353_v37 }
  0xd1   :  { %1532 = vtanh.f32 %v1921_v48 }
  0xd2   :  { %v358_v38 = vsel %vm357_vm12, %v1529_v63, %v354_v19 }
  0xd3   :  { %v363_v52 = vsel %vm360_vm13, %v362_v51, %v358_v38  ;;  %vm767_vm13 = vcmp.eq.s32.totalorder %v1813_v16, 3 }
  0xd7   :  { %v1533_v39 = vpop.eup %1532 }
  0xd8   :  { %v1924_v53 = vmul.f32 %v1533_v39, %v363_v52 }
  0xda   :  { %v383_v56 = vpack.c.bf16 %v1924_v53, %v1924_v53 }
  0xdc   :  { %392 = vmatmul.bf16.vlgmr.msrb.gmra.mxu0 %v383_v56  ;;  %405 = vmatmul.bf16.vlgmr.msrb.gmra.mxu1 %v383_v56 }
  0xdd   :  { %418 = vmatmul.bf16.vlgmr.msrb.gmra.mxu2 %v383_v56  ;;  %431 = vmatmul.bf16.vlgmr.msrb.gmra.mxu3 %v383_v56 }
  0xde   :  { %648 = vmatpush.bf16.msrb.mxu0 %v1745_v4  ;;  %661 = vmatpush.bf16.msrb.mxu1 %v1747_v8 }
  0xdf   :  { %674 = vmatpush.bf16.msrb.mxu2 %v1749_v9  ;;  %687 = vmatpush.bf16.msrb.mxu3 %v1760_v22 }
  0xe2   :  { %649 = vmatpush.bf16.msrb.mxu0 %v1752_v13  ;;  %662 = vmatpush.bf16.msrb.mxu1 %v1756_v17 }
  0xe3   :  { %675 = vmatpush.bf16.msrb.mxu2 %v1758_v18  ;;  %688 = vmatpush.bf16.msrb.mxu3 %v1772_v35 }
  0xe6   :  { %650 = vmatpush.bf16.msrb.mxu0 %v1764_v29  ;;  %663 = vmatpush.bf16.msrb.mxu1 %v1768_v33 }
  0xe7   :  { %676 = vmatpush.bf16.msrb.mxu2 %v1770_v34  ;;  %689 = vmatpush.bf16.msrb.mxu3 %v1778_v43 }
  0xea   :  { %651 = vmatpush.bf16.msrb.mxu0 %v1776_v42  ;;  %664 = vmatpush.bf16.msrb.mxu1 %v1782_v46 }
  0xeb   :  { %677 = vmatpush.bf16.msrb.mxu2 %v1784_v47  ;;  %690 = vmatpush.bf16.msrb.mxu3 %v1790_v55 }
  0xee   :  { %652 = vmatpush.bf16.msrb.mxu0 %v1788_v54  ;;  %665 = vmatpush.bf16.msrb.mxu1 %v1794_v58 }
  0xef   :  { %678 = vmatpush.bf16.msrb.mxu2 %v1796_v59  ;;  %691 = vmatpush.bf16.msrb.mxu3 %v1802_v5 }
  0xf2   :  { %653 = vmatpush.bf16.msrb.mxu0 %v1800_v3  ;;  %666 = vmatpush.bf16.msrb.mxu1 %v1806_v11 }
  0xf3   :  { %679 = vmatpush.bf16.msrb.mxu2 %v1808_v12  ;;  %692 = vmatpush.bf16.msrb.mxu3 %v1824_v25 }
  0xf6   :  { %654 = vmatpush.bf16.msrb.mxu0 %v1822_v24  ;;  %667 = vmatpush.bf16.msrb.mxu1 %v1828_v28 }
  0xf7   :  { %680 = vmatpush.bf16.msrb.mxu2 %v1830_v30  ;;  %693 = vmatpush.bf16.msrb.mxu3 %v1836_v41 }
  0xfa   :  { %655 = vmatpush.bf16.msrb.mxu0 %v1834_v40  ;;  %668 = vmatpush.bf16.msrb.mxu1 %v1840_v44 }
  0xfb   :  { %681 = vmatpush.bf16.msrb.mxu2 %v1842_v45  ;;  %694 = vmatpush.bf16.msrb.mxu3 %v1848_v50 }
 0x159   :  { %v393_v60 = vpop.f32.mrf.mxu0  ;;  %v406_v61 = vpop.f32.mrf.mxu1 }
 0x15a   :  { %v436_v62 = vadd.f32 %v393_v60, %v379_v36  ;;  %v437_v63 = vadd.f32 %v406_v61, %v380_v57 }
 0x15c   :  { %v1453_v0 = vmul.f32 -1.442695, %v436_v62  ;;  %v1454_v1 = vmul.f32 -1.442695, %v437_v63 }
 0x15e   :  { %1534 = vpow2.f32 %v1453_v0 }
 0x15f   :  { %1536 = vpow2.f32 %v1454_v1 }
 0x160   :  { %v419_v6 = vpop.f32.mrf.mxu2  ;;  %v432_v7 = vpop.f32.mrf.mxu3 }
 0x161   :  { %v438_v10 = vadd.f32 %v419_v6, %v381_v2  ;;  %v395_v14 = vpop.f32.mrf.mxu0  ;;  %v408_v15 = vpop.f32.mrf.mxu1  ;;  %v439_v52 = vadd.f32 %v432_v7, %v382_v20 }
 0x163   :  { %v1455_v23 = vmul.f32 -1.442695, %v438_v10 }
 0x164   :  { %v1535_v26 = vpop.eup %1534 }
 0x165   :  { %v1537_v27 = vpop.eup %1536  ;;  %v449_v31 = vadd.f32 1.0, %v1535_v26  ;;  %1538 = vpow2.f32 %v1455_v23 }
 0x166   :  { %v450_v32 = vadd.f32 1.0, %v1537_v27 }
 0x167   :  { %1540 = vrcp.f32 %v449_v31  ;;  %v463_v62 = vand.u32 2147483648, %v449_v31  ;;  %v461_v1 = vand.u32 2147483647, %v449_v31  ;;  %vm457_vm1 = vweird.f32 %v449_v31 }
 0x168   :  { %1542 = vrcp.f32 %v450_v32  ;;  %v421_v37 = vpop.f32.mrf.mxu2  ;;  %v434_v19 = vpop.f32.mrf.mxu3  ;;  %v478_v63 = vand.u32 2147483648, %v450_v32  ;;  %v476_v6 = vand.u32 2147483647, %v450_v32  ;;  %vm472_vm2 = vweird.f32 %v450_v32 }
 0x169   :  { %v464_v15 = vor.u32 1.1754944e-38, %v463_v62  ;;  %vm462_vm5 = vcmp.eq.f32.partialorder %v461_v1, 8.507059e+37 }
 0x16a   :  { %v479_v26 = vor.u32 1.1754944e-38, %v478_v63  ;;  %vm477_vm6 = vcmp.eq.f32.partialorder %v476_v6, 8.507059e+37 }
 0x16b   :  { %v1539_v38 = vpop.eup %1538 }
 0x16c   :  { %v451_v51 = vadd.f32 1.0, %v1539_v38  ;;  %v375_v38 = vpop.permute.xlu0 %374 }
 0x16d   :  { %v1541_v39 = vpop.eup %1540  ;;  %vm376_vm10 = vcmp.eq.s32.totalorder %v375_v38, 1 }
 0x16e   :  { %v1543_v56 = vpop.eup %1542  ;;  %v453_v36 = vmul.f32 %v1541_v39, %v449_v31  ;;  %1544 = vrcp.f32 %v451_v51  ;;  %vm458_vm15 = vweird.f32 %v1541_v39  ;;  %vm487_vm8 = vweird.f32 %v451_v51 }
 0x16f   :  { %v468_v57 = vmul.f32 %v1543_v56, %v450_v32  ;;  %1546 = vtanh.f32 %v439_v52  ;;  %vm473_vm0 = vweird.f32 %v1543_v56  ;;  %vm459_vm3 = vmor %vm457_vm1, %vm458_vm15 }
 0x170   :  { %v454_v60 = vsub.f32 1.0, %v453_v36  ;;  %vm474_vm4 = vmor %vm472_vm2, %vm473_vm0 }
 0x171   :  { %v469_v61 = vsub.f32 1.0, %v468_v57 }
 0x172   :  { %v455_v0 = vmul.f32 %v1541_v39, %v454_v60 }
 0x173   :  { %v470_v2 = vmul.f32 %v1543_v56, %v469_v61  ;;  %v493_v61 = vand.u32 2147483648, %v451_v51 }
 0x174   :  { %v1545_v10 = vpop.eup %1544  ;;  %v456_v14 = vadd.f32 %v1541_v39, %v455_v0  ;;  %v507_v62 = vpop.permute.xlu0 %506 }
 0x175   :  { %v483_v7 = vmul.f32 %v1545_v10, %v451_v51  ;;  %v471_v23 = vadd.f32 %v1543_v56, %v470_v2  ;;  %v1547_v37 = vpop.eup %1546  ;;  %vm488_vm7 = vweird.f32 %v1545_v10  ;;  %vm508_vm12 = vcmp.eq.s32.totalorder %v507_v62, 1 }
 0x176   :  { %v460_v27 = vsel %vm459_vm3, %v1541_v39, %v456_v14  ;;  %v491_v39 = vand.u32 2147483647, %v451_v51  ;;  %vm489_vm9 = vmor %vm487_vm8, %vm488_vm7  ;;  %v377_v2 = vsel %vm376_vm10, %v1924_v53, 0.0  ;;  %v511_v53 = vld [vmem:[#allocation3 + $0x40] sm:$0xff]  ;;  %v512_v51 = vld [vmem:[#allocation3 + $0x48] sm:$0xff] }
 0x177   :  { %v484_v19 = vsub.f32 1.0, %v483_v7  ;;  %v465_v20 = vsel %vm462_vm5, %v464_v15, %v460_v27  ;;  %v475_v49 = vsel %vm474_vm4, %v1543_v56, %v471_v23  ;;  %v494_v56 = vor.u32 1.1754944e-38, %v493_v61 }
 0x178   :  { %v480_v52 = vsel %vm477_vm6, %v479_v26, %v475_v49  ;;  %v499_v36 = vmul.f32 %v1547_v37, %v465_v20  ;;  %vm492_vm11 = vcmp.eq.f32.partialorder %v491_v39, 8.507059e+37  ;;  %v513_v37 = vld [vmem:[#allocation3 + $0x50] sm:$0xff] }
 0x179   :  { %v498_v57 = vmul.f32 %v480_v52, %v1921_v48  ;;  %v485_v31 = vmul.f32 %v1545_v10, %v484_v19 }
 0x17b   :  { %v1963_v32 = vadd.f32 %v499_v36, %v498_v57  ;;  %v486_v60 = vadd.f32 %v1545_v10, %v485_v31 }
 0x17d   :  { %1548 = vtanh.f32 %v1963_v32  ;;  %v490_v63 = vsel %vm489_vm9, %v1545_v10, %v486_v60 }
 0x17e   :  { %v495_v1 = vsel %vm492_vm11, %v494_v56, %v490_v63  ;;  %v514_v63 = vld [vmem:[#allocation3 + $0x58] sm:$0xff]  ;;  %v768_v56 = vsel %vm767_vm13, 1, %v1705_v21  ;;  %vm899_vm11 = vcmp.eq.s32.totalorder %v1813_v16, 4 }
 0x17f   :  { %770 = vperm.xlu1 %1514, %v768_v56  }
 0x183   :  { %v1549_v0 = vpop.eup %1548 }
 0x184   :  { %v502_v48 = vmul.f32 %v1549_v0, %v495_v1 }
 0x186   :  { %v1967_v6 = vsel %vm508_vm12, %v502_v48, %v377_v2  ;;  %v515_v14 = vpack.c.bf16 %v502_v48, %v502_v48 }
 0x188   :  { %524 = vmatmul.bf16.vlgmr.msra.gmra.mxu0 %v515_v14  ;;  %537 = vmatmul.bf16.vlgmr.msra.gmra.mxu1 %v515_v14 }
 0x189   :  { %550 = vmatmul.bf16.vlgmr.msra.gmra.mxu2 %v515_v14  ;;  %563 = vmatmul.bf16.vlgmr.msra.gmra.mxu3 %v515_v14 }
 0x18a   :  { %780 = vmatpush.bf16.msra.mxu0 %v1745_v4  ;;  %793 = vmatpush.bf16.msra.mxu1 %v1747_v8 }
 0x18b   :  { %806 = vmatpush.bf16.msra.mxu2 %v1749_v9  ;;  %819 = vmatpush.bf16.msra.mxu3 %v1760_v22 }
 0x18e   :  { %781 = vmatpush.bf16.msra.mxu0 %v1752_v13  ;;  %794 = vmatpush.bf16.msra.mxu1 %v1756_v17 }
 0x18f   :  { %807 = vmatpush.bf16.msra.mxu2 %v1758_v18  ;;  %820 = vmatpush.bf16.msra.mxu3 %v1772_v35 }
 0x192   :  { %782 = vmatpush.bf16.msra.mxu0 %v1764_v29  ;;  %795 = vmatpush.bf16.msra.mxu1 %v1768_v33 }
 0x193   :  { %808 = vmatpush.bf16.msra.mxu2 %v1770_v34  ;;  %821 = vmatpush.bf16.msra.mxu3 %v1778_v43 }
 0x196   :  { %783 = vmatpush.bf16.msra.mxu0 %v1776_v42  ;;  %796 = vmatpush.bf16.msra.mxu1 %v1782_v46 }
 0x197   :  { %809 = vmatpush.bf16.msra.mxu2 %v1784_v47  ;;  %822 = vmatpush.bf16.msra.mxu3 %v1790_v55 }
 0x19a   :  { %784 = vmatpush.bf16.msra.mxu0 %v1788_v54  ;;  %797 = vmatpush.bf16.msra.mxu1 %v1794_v58 }
 0x19b   :  { %810 = vmatpush.bf16.msra.mxu2 %v1796_v59  ;;  %823 = vmatpush.bf16.msra.mxu3 %v1802_v5 }
 0x19e   :  { %785 = vmatpush.bf16.msra.mxu0 %v1800_v3  ;;  %798 = vmatpush.bf16.msra.mxu1 %v1806_v11 }
 0x19f   :  { %811 = vmatpush.bf16.msra.mxu2 %v1808_v12  ;;  %824 = vmatpush.bf16.msra.mxu3 %v1824_v25 }
 0x1a2   :  { %786 = vmatpush.bf16.msra.mxu0 %v1822_v24  ;;  %799 = vmatpush.bf16.msra.mxu1 %v1828_v28 }
 0x1a3   :  { %812 = vmatpush.bf16.msra.mxu2 %v1830_v30  ;;  %825 = vmatpush.bf16.msra.mxu3 %v1836_v41 }
 0x1a6   :  { %787 = vmatpush.bf16.msra.mxu0 %v1834_v40  ;;  %800 = vmatpush.bf16.msra.mxu1 %v1840_v44 }
 0x1a7   :  { %813 = vmatpush.bf16.msra.mxu2 %v1842_v45  ;;  %826 = vmatpush.bf16.msra.mxu3 %v1848_v50 }
 0x205   :  { %v525_v10 = vpop.f32.mrf.mxu0  ;;  %v538_v7 = vpop.f32.mrf.mxu1 }
 0x206   :  { %v568_v15 = vadd.f32 %v525_v10, %v511_v53  ;;  %v569_v23 = vadd.f32 %v538_v7, %v512_v51 }
 0x208   :  { %v1456_v26 = vmul.f32 -1.442695, %v568_v15  ;;  %v1457_v27 = vmul.f32 -1.442695, %v569_v23 }
 0x20a   :  { %1550 = vpow2.f32 %v1456_v26 }
 0x20b   :  { %1552 = vpow2.f32 %v1457_v27 }
 0x20c   :  { %v551_v19 = vpop.f32.mrf.mxu2  ;;  %v564_v20 = vpop.f32.mrf.mxu3 }
 0x20d   :  { %v570_v49 = vadd.f32 %v551_v19, %v513_v37  ;;  %v527_v38 = vpop.f32.mrf.mxu0  ;;  %v540_v52 = vpop.f32.mrf.mxu1  ;;  %v571_v2 = vadd.f32 %v564_v20, %v514_v63 }
 0x20f   :  { %v1458_v36 = vmul.f32 -1.442695, %v570_v49 }
 0x210   :  { %v1551_v57 = vpop.eup %1550 }
 0x211   :  { %v1553_v31 = vpop.eup %1552  ;;  %v581_v60 = vadd.f32 1.0, %v1551_v57  ;;  %1554 = vpow2.f32 %v1458_v36 }
 0x212   :  { %v582_v61 = vadd.f32 1.0, %v1553_v31 }
 0x213   :  { %1556 = vrcp.f32 %v581_v60  ;;  %v595_v15 = vand.u32 2147483648, %v581_v60  ;;  %v593_v27 = vand.u32 2147483647, %v581_v60  ;;  %vm589_vm0 = vweird.f32 %v581_v60 }
 0x214   :  { %1558 = vrcp.f32 %v582_v61  ;;  %v553_v39 = vpop.f32.mrf.mxu2  ;;  %v566_v62 = vpop.f32.mrf.mxu3  ;;  %v610_v23 = vand.u32 2147483648, %v582_v61  ;;  %v608_v19 = vand.u32 2147483647, %v582_v61  ;;  %vm604_vm1 = vweird.f32 %v582_v61 }
 0x215   :  { %v596_v52 = vor.u32 1.1754944e-38, %v595_v15  ;;  %vm594_vm4 = vcmp.eq.f32.partialorder %v593_v27, 8.507059e+37 }
 0x216   :  { %v611_v57 = vor.u32 1.1754944e-38, %v610_v23  ;;  %vm609_vm5 = vcmp.eq.f32.partialorder %v608_v19, 8.507059e+37 }
 0x217   :  { %v1555_v0 = vpop.eup %1554 }
 0x218   :  { %v583_v1 = vadd.f32 1.0, %v1555_v0 }
 0x219   :  { %v1557_v48 = vpop.eup %1556 }
 0x21a   :  { %v1559_v14 = vpop.eup %1558  ;;  %v585_v53 = vmul.f32 %v1557_v48, %v581_v60  ;;  %1560 = vrcp.f32 %v583_v1  ;;  %vm590_vm14 = vweird.f32 %v1557_v48  ;;  %vm619_vm7 = vweird.f32 %v583_v1 }
 0x21b   :  { %v600_v51 = vmul.f32 %v1559_v14, %v582_v61  ;;  %1562 = vtanh.f32 %v571_v2  ;;  %vm605_vm15 = vweird.f32 %v1559_v14  ;;  %vm591_vm2 = vmor %vm589_vm0, %vm590_vm14 }
 0x21c   :  { %v586_v10 = vsub.f32 1.0, %v585_v53  ;;  %vm606_vm3 = vmor %vm604_vm1, %vm605_vm15 }
 0x21d   :  { %v601_v7 = vsub.f32 1.0, %v600_v51 }
 0x21e   :  { %v587_v26 = vmul.f32 %v1557_v48, %v586_v10  ;;  %v625_v10 = vand.u32 2147483648, %v583_v1 }
 0x21f   :  { %v602_v37 = vmul.f32 %v1559_v14, %v601_v7  ;;  %v639_v7 = vpop.permute.xlu1 %638 }
 0x220   :  { %v1561_v49 = vpop.eup %1560  ;;  %v588_v38 = vadd.f32 %v1557_v48, %v587_v26  ;;  %v626_v23 = vor.u32 1.1754944e-38, %v625_v10  ;;  %vm640_vm10 = vcmp.eq.s32.totalorder %v639_v7, 1  ;;  %v646_v7 = vld [vmem:[#allocation3 + $0x78] sm:$0xff] }
 0x221   :  { %v615_v20 = vmul.f32 %v1561_v49, %v583_v1  ;;  %v603_v36 = vadd.f32 %v1559_v14, %v602_v37  ;;  %v1563_v39 = vpop.eup %1562  ;;  %vm620_vm6 = vweird.f32 %v1561_v49 }
 0x222   :  { %v592_v31 = vsel %vm591_vm2, %v1557_v48, %v588_v38  ;;  %v623_v48 = vand.u32 2147483647, %v583_v1  ;;  %vm621_vm8 = vmor %vm619_vm7, %vm620_vm6  ;;  %v644_v1 = vld [vmem:[#allocation3 + $0x68] sm:$0xff] }
 0x223   :  { %v616_v62 = vsub.f32 1.0, %v615_v20  ;;  %v597_v63 = vsel %vm594_vm4, %v596_v52, %v592_v31  ;;  %v607_v56 = vsel %vm606_vm3, %v1559_v14, %v603_v36 }
 0x224   :  { %v612_v0 = vsel %vm609_vm5, %v611_v57, %v607_v56  ;;  %v631_v2 = vmul.f32 %v1563_v39, %v597_v63  ;;  %vm624_vm9 = vcmp.eq.f32.partialorder %v623_v48, 8.507059e+37  ;;  %v645_v57 = vld [vmem:[#allocation3 + $0x70] sm:$0xff] }
 0x225   :  { %v630_v53 = vmul.f32 %v612_v0, %v1963_v32  ;;  %v617_v51 = vmul.f32 %v1561_v49, %v616_v62 }
 0x227   :  { %v2004_v60 = vadd.f32 %v631_v2, %v630_v53  ;;  %v618_v61 = vadd.f32 %v1561_v49, %v617_v51 }
 0x229   :  { %1564 = vtanh.f32 %v2004_v60  ;;  %v622_v15 = vsel %vm621_vm8, %v1561_v49, %v618_v61 }
 0x22a   :  { %v627_v26 = vsel %vm624_vm9, %v626_v23, %v622_v15  ;;  %v900_v15 = vsel %vm899_vm11, 1, %v1705_v21 }
 0x22b   :  { %902 = vperm.xlu2 %1515, %v900_v15  }
 0x22f   :  { %v1565_v14 = vpop.eup %1564 }
 0x230   :  { %v634_v27 = vmul.f32 %v1565_v14, %v627_v26 }
 0x232   :  { %v2008_v32 = vsel %vm640_vm10, %v634_v27, %v1967_v6  ;;  %v647_v37 = vpack.c.bf16 %v634_v27, %v634_v27  ;;  %v643_v6 = vld [vmem:[#allocation3 + $0x60] sm:$0xff] }
 0x234   :  { %656 = vmatmul.bf16.vlgmr.msrb.gmra.mxu0 %v647_v37  ;;  %669 = vmatmul.bf16.vlgmr.msrb.gmra.mxu1 %v647_v37 }
 0x235   :  { %682 = vmatmul.bf16.vlgmr.msrb.gmra.mxu2 %v647_v37  ;;  %695 = vmatmul.bf16.vlgmr.msrb.gmra.mxu3 %v647_v37 }
 0x236   :  { %912 = vmatpush.bf16.msrb.mxu0 %v1745_v4  ;;  %925 = vmatpush.bf16.msrb.mxu1 %v1747_v8 }
 0x237   :  { %938 = vmatpush.bf16.msrb.mxu2 %v1749_v9  ;;  %951 = vmatpush.bf16.msrb.mxu3 %v1760_v22 }
 0x23a   :  { %913 = vmatpush.bf16.msrb.mxu0 %v1752_v13  ;;  %926 = vmatpush.bf16.msrb.mxu1 %v1756_v17 }
 0x23b   :  { %939 = vmatpush.bf16.msrb.mxu2 %v1758_v18  ;;  %952 = vmatpush.bf16.msrb.mxu3 %v1772_v35 }
 0x23e   :  { %914 = vmatpush.bf16.msrb.mxu0 %v1764_v29  ;;  %927 = vmatpush.bf16.msrb.mxu1 %v1768_v33 }
 0x23f   :  { %940 = vmatpush.bf16.msrb.mxu2 %v1770_v34  ;;  %953 = vmatpush.bf16.msrb.mxu3 %v1778_v43 }
 0x242   :  { %915 = vmatpush.bf16.msrb.mxu0 %v1776_v42  ;;  %928 = vmatpush.bf16.msrb.mxu1 %v1782_v46 }
 0x243   :  { %941 = vmatpush.bf16.msrb.mxu2 %v1784_v47  ;;  %954 = vmatpush.bf16.msrb.mxu3 %v1790_v55 }
 0x246   :  { %916 = vmatpush.bf16.msrb.mxu0 %v1788_v54  ;;  %929 = vmatpush.bf16.msrb.mxu1 %v1794_v58 }
 0x247   :  { %942 = vmatpush.bf16.msrb.mxu2 %v1796_v59  ;;  %955 = vmatpush.bf16.msrb.mxu3 %v1802_v5 }
 0x24a   :  { %917 = vmatpush.bf16.msrb.mxu0 %v1800_v3  ;;  %930 = vmatpush.bf16.msrb.mxu1 %v1806_v11 }
 0x24b   :  { %943 = vmatpush.bf16.msrb.mxu2 %v1808_v12  ;;  %956 = vmatpush.bf16.msrb.mxu3 %v1824_v25 }
 0x24e   :  { %918 = vmatpush.bf16.msrb.mxu0 %v1822_v24  ;;  %931 = vmatpush.bf16.msrb.mxu1 %v1828_v28 }
 0x24f   :  { %944 = vmatpush.bf16.msrb.mxu2 %v1830_v30  ;;  %957 = vmatpush.bf16.msrb.mxu3 %v1836_v41 }
 0x252   :  { %919 = vmatpush.bf16.msrb.mxu0 %v1834_v40  ;;  %932 = vmatpush.bf16.msrb.mxu1 %v1840_v44 }
 0x253   :  { %945 = vmatpush.bf16.msrb.mxu2 %v1842_v45  ;;  %958 = vmatpush.bf16.msrb.mxu3 %v1848_v50 }
 0x2b1   :  { %v657_v19 = vpop.f32.mrf.mxu0  ;;  %v670_v49 = vpop.f32.mrf.mxu1 }
 0x2b2   :  { %v700_v38 = vadd.f32 %v657_v19, %v643_v6  ;;  %v701_v20 = vadd.f32 %v670_v49, %v644_v1 }
 0x2b4   :  { %v1459_v52 = vmul.f32 -1.442695, %v700_v38  ;;  %v1460_v36 = vmul.f32 -1.442695, %v701_v20 }
 0x2b6   :  { %1566 = vpow2.f32 %v1459_v52 }
 0x2b7   :  { %1568 = vpow2.f32 %v1460_v36 }
 0x2b8   :  { %v683_v31 = vpop.f32.mrf.mxu2  ;;  %v696_v39 = vpop.f32.mrf.mxu3 }
 0x2b9   :  { %v702_v62 = vadd.f32 %v683_v31, %v645_v57  ;;  %v659_v63 = vpop.f32.mrf.mxu0  ;;  %v672_v56 = vpop.f32.mrf.mxu1  ;;  %v703_v27 = vadd.f32 %v696_v39, %v646_v7 }
 0x2bb   :  { %v1461_v0 = vmul.f32 -1.442695, %v702_v62 }
 0x2bc   :  { %v1567_v2 = vpop.eup %1566 }
 0x2bd   :  { %v1569_v53 = vpop.eup %1568  ;;  %v713_v51 = vadd.f32 1.0, %v1567_v2  ;;  %1570 = vpow2.f32 %v1461_v0 }
 0x2be   :  { %v714_v61 = vadd.f32 1.0, %v1569_v53 }
 0x2bf   :  { %1572 = vrcp.f32 %v713_v51  ;;  %v727_v38 = vand.u32 2147483648, %v713_v51  ;;  %v725_v16 = vand.u32 2147483647, %v713_v51  ;;  %vm721_vm14 = vweird.f32 %v713_v51 }
 0x2c0   :  { %1574 = vrcp.f32 %v714_v61  ;;  %v685_v10 = vpop.f32.mrf.mxu2  ;;  %v698_v48 = vpop.f32.mrf.mxu3  ;;  %v742_v20 = vand.u32 2147483648, %v714_v61  ;;  %v740_v57 = vand.u32 2147483647, %v714_v61  ;;  %vm736_vm15 = vweird.f32 %v714_v61 }
 0x2c1   :  { %v728_v63 = vor.u32 1.1754944e-38, %v727_v38  ;;  %vm726_vm2 = vcmp.eq.f32.partialorder %v725_v16, 8.507059e+37 }
 0x2c2   :  { %v743_v0 = vor.u32 1.1754944e-38, %v742_v20  ;;  %vm741_vm3 = vcmp.eq.f32.partialorder %v740_v57, 8.507059e+37 }
 0x2c3   :  { %v1571_v23 = vpop.eup %1570 }
 0x2c4   :  { %v715_v14 = vadd.f32 1.0, %v1571_v23 }
 0x2c5   :  { %v1573_v26 = vpop.eup %1572 }
 0x2c6   :  { %v1575_v37 = vpop.eup %1574  ;;  %v717_v6 = vmul.f32 %v1573_v26, %v713_v51  ;;  %1576 = vrcp.f32 %v715_v14  ;;  %vm722_vm12 = vweird.f32 %v1573_v26  ;;  %vm751_vm5 = vweird.f32 %v715_v14 }
 0x2c7   :  { %v732_v1 = vmul.f32 %v1575_v37, %v714_v61  ;;  %1578 = vtanh.f32 %v703_v27  ;;  %vm737_vm13 = vweird.f32 %v1575_v37  ;;  %vm723_vm0 = vmor %vm721_vm14, %vm722_vm12 }
 0x2c8   :  { %v718_v19 = vsub.f32 1.0, %v717_v6  ;;  %vm738_vm1 = vmor %vm736_vm15, %vm737_vm13 }
 0x2c9   :  { %v733_v49 = vsub.f32 1.0, %v732_v1  ;;  %v757_v1 = vand.u32 2147483648, %v715_v14 }
 0x2ca   :  { %v719_v52 = vmul.f32 %v1573_v26, %v718_v19  ;;  %v771_v19 = vpop.permute.xlu1 %770 }
 0x2cb   :  { %v734_v36 = vmul.f32 %v1575_v37, %v733_v49  ;;  %v758_v38 = vor.u32 1.1754944e-38, %v757_v1  ;;  %vm772_vm8 = vcmp.eq.s32.totalorder %v771_v19, 1  ;;  %v778_v19 = vld [vmem:[#allocation3 + $0x98] sm:$0xff] }
 0x2cc   :  { %v1577_v31 = vpop.eup %1576  ;;  %v720_v62 = vadd.f32 %v1573_v26, %v719_v52 }
 0x2cd   :  { %v747_v39 = vmul.f32 %v1577_v31, %v715_v14  ;;  %v735_v56 = vadd.f32 %v1575_v37, %v734_v36  ;;  %v1579_v53 = vpop.eup %1578  ;;  %vm752_vm4 = vweird.f32 %v1577_v31 }
 0x2ce   :  { %v724_v2 = vsel %vm723_vm0, %v1573_v26, %v720_v62  ;;  %v755_v26 = vand.u32 2147483647, %v715_v14  ;;  %vm753_vm6 = vmor %vm751_vm5, %vm752_vm4  ;;  %v776_v14 = vld [vmem:[#allocation3 + $0x88] sm:$0xff] }
 0x2cf   :  { %v748_v10 = vsub.f32 1.0, %v747_v39  ;;  %v729_v48 = vsel %vm726_vm2, %v728_v63, %v724_v2  ;;  %v739_v7 = vsel %vm738_vm1, %v1575_v37, %v735_v56  ;;  %v777_v56 = vld [vmem:[#allocation3 + $0x90] sm:$0xff] }
 0x2d0   :  { %v744_v15 = vsel %vm741_vm3, %v743_v0, %v739_v7  ;;  %v763_v23 = vmul.f32 %v1579_v53, %v729_v48  ;;  %vm756_vm7 = vcmp.eq.f32.partialorder %v755_v26, 8.507059e+37  ;;  %v2086_v26 = vld [vmem:[%s2156_s1] sm:$0xff] }
 0x2d1   :  { %v762_v27 = vmul.f32 %v744_v15, %v2004_v60  ;;  %v749_v6 = vmul.f32 %v1577_v31, %v748_v10  ;;  %vm1031_vm9 = vcmp.eq.s32.totalorder %v2086_v26, 5 }
 0x2d3   :  { %v2045_v51 = vadd.f32 %v763_v23, %v762_v27  ;;  %v750_v61 = vadd.f32 %v1577_v31, %v749_v6 }
 0x2d5   :  { %1580 = vtanh.f32 %v2045_v51  ;;  %v754_v49 = vsel %vm753_vm6, %v1577_v31, %v750_v61 }
 0x2d6   :  { %v759_v20 = vsel %vm756_vm7, %v758_v38, %v754_v49  ;;  %v1032_v49 = vsel %vm1031_vm9, 1, %v1705_v21  ;;  %vm1163_vm7 = vcmp.eq.s32.totalorder %v2086_v26, 6 }
 0x2d7   :  { %1034 = vperm.xlu2 %1515, %v1032_v49  }
 0x2db   :  { %v1581_v37 = vpop.eup %1580 }
 0x2dc   :  { %v766_v52 = vmul.f32 %v1581_v37, %v759_v20 }
 0x2de   :  { %v2049_v60 = vsel %vm772_vm8, %v766_v52, %v2008_v32  ;;  %v779_v16 = vpack.c.bf16 %v766_v52, %v766_v52  ;;  %v775_v32 = vld [vmem:[#allocation3 + $0x80] sm:$0xff] }
 0x2e0   :  { %788 = vmatmul.bf16.vlgmr.msra.gmra.mxu0 %v779_v16  ;;  %801 = vmatmul.bf16.vlgmr.msra.gmra.mxu1 %v779_v16 }
 0x2e1   :  { %814 = vmatmul.bf16.vlgmr.msra.gmra.mxu2 %v779_v16  ;;  %827 = vmatmul.bf16.vlgmr.msra.gmra.mxu3 %v779_v16 }
 0x2e2   :  { %1044 = vmatpush.bf16.msra.mxu0 %v1745_v4  ;;  %1057 = vmatpush.bf16.msra.mxu1 %v1747_v8 }
 0x2e3   :  { %1070 = vmatpush.bf16.msra.mxu2 %v1749_v9  ;;  %1083 = vmatpush.bf16.msra.mxu3 %v1760_v22 }
 0x2e6   :  { %1045 = vmatpush.bf16.msra.mxu0 %v1752_v13  ;;  %1058 = vmatpush.bf16.msra.mxu1 %v1756_v17 }
 0x2e7   :  { %1071 = vmatpush.bf16.msra.mxu2 %v1758_v18  ;;  %1084 = vmatpush.bf16.msra.mxu3 %v1772_v35 }
 0x2ea   :  { %1046 = vmatpush.bf16.msra.mxu0 %v1764_v29  ;;  %1059 = vmatpush.bf16.msra.mxu1 %v1768_v33 }
 0x2eb   :  { %1072 = vmatpush.bf16.msra.mxu2 %v1770_v34  ;;  %1085 = vmatpush.bf16.msra.mxu3 %v1778_v43 }
 0x2ee   :  { %1047 = vmatpush.bf16.msra.mxu0 %v1776_v42  ;;  %1060 = vmatpush.bf16.msra.mxu1 %v1782_v46 }
 0x2ef   :  { %1073 = vmatpush.bf16.msra.mxu2 %v1784_v47  ;;  %1086 = vmatpush.bf16.msra.mxu3 %v1790_v55 }
 0x2f2   :  { %1048 = vmatpush.bf16.msra.mxu0 %v1788_v54  ;;  %1061 = vmatpush.bf16.msra.mxu1 %v1794_v58 }
 0x2f3   :  { %1074 = vmatpush.bf16.msra.mxu2 %v1796_v59  ;;  %1087 = vmatpush.bf16.msra.mxu3 %v1802_v5 }
 0x2f6   :  { %1049 = vmatpush.bf16.msra.mxu0 %v1800_v3  ;;  %1062 = vmatpush.bf16.msra.mxu1 %v1806_v11 }
 0x2f7   :  { %1075 = vmatpush.bf16.msra.mxu2 %v1808_v12  ;;  %1088 = vmatpush.bf16.msra.mxu3 %v1824_v25 }
 0x2fa   :  { %1050 = vmatpush.bf16.msra.mxu0 %v1822_v24  ;;  %1063 = vmatpush.bf16.msra.mxu1 %v1828_v28 }
 0x2fb   :  { %1076 = vmatpush.bf16.msra.mxu2 %v1830_v30  ;;  %1089 = vmatpush.bf16.msra.mxu3 %v1836_v41 }
 0x2fe   :  { %1051 = vmatpush.bf16.msra.mxu0 %v1834_v40  ;;  %1064 = vmatpush.bf16.msra.mxu1 %v1840_v44 }
 0x2ff   :  { %1077 = vmatpush.bf16.msra.mxu2 %v1842_v45  ;;  %1090 = vmatpush.bf16.msra.mxu3 %v1848_v50 }
 0x35d   :  { %v789_v36 = vpop.f32.mrf.mxu0  ;;  %v802_v57 = vpop.f32.mrf.mxu1 }
 0x35e   :  { %v832_v31 = vadd.f32 %v789_v36, %v775_v32  ;;  %v833_v62 = vadd.f32 %v802_v57, %v776_v14 }
 0x360   :  { %v1462_v39 = vmul.f32 -1.442695, %v832_v31  ;;  %v1463_v63 = vmul.f32 -1.442695, %v833_v62 }
 0x362   :  { %1582 = vpow2.f32 %v1462_v39 }
 0x363   :  { %1584 = vpow2.f32 %v1463_v63 }
 0x364   :  { %v815_v0 = vpop.f32.mrf.mxu2  ;;  %v828_v2 = vpop.f32.mrf.mxu3 }
 0x365   :  { %v834_v53 = vadd.f32 %v815_v0, %v777_v56  ;;  %v791_v10 = vpop.f32.mrf.mxu0  ;;  %v804_v48 = vpop.f32.mrf.mxu1  ;;  %v835_v52 = vadd.f32 %v828_v2, %v778_v19 }
 0x367   :  { %v1464_v7 = vmul.f32 -1.442695, %v834_v53 }
 0x368   :  { %v1583_v15 = vpop.eup %1582 }
 0x369   :  { %v1585_v23 = vpop.eup %1584  ;;  %v845_v27 = vadd.f32 1.0, %v1583_v15  ;;  %1586 = vpow2.f32 %v1464_v7 }
 0x36a   :  { %v846_v6 = vadd.f32 1.0, %v1585_v23 }
 0x36b   :  { %1588 = vrcp.f32 %v845_v27  ;;  %v859_v31 = vand.u32 2147483648, %v845_v27  ;;  %v857_v63 = vand.u32 2147483647, %v845_v27  ;;  %vm853_vm12 = vweird.f32 %v845_v27 }
 0x36c   :  { %1590 = vrcp.f32 %v846_v6  ;;  %v817_v61 = vpop.f32.mrf.mxu2  ;;  %v830_v1 = vpop.f32.mrf.mxu3  ;;  %v874_v62 = vand.u32 2147483648, %v846_v6  ;;  %v872_v0 = vand.u32 2147483647, %v846_v6  ;;  %vm868_vm13 = vweird.f32 %v846_v6 }
 0x36d   :  { %v860_v48 = vor.u32 1.1754944e-38, %v859_v31  ;;  %vm858_vm0 = vcmp.eq.f32.partialorder %v857_v63, 8.507059e+37 }
 0x36e   :  { %v875_v15 = vor.u32 1.1754944e-38, %v874_v62  ;;  %vm873_vm1 = vcmp.eq.f32.partialorder %v872_v0, 8.507059e+37 }
 0x36f   :  { %v1587_v38 = vpop.eup %1586 }
 0x370   :  { %v847_v37 = vadd.f32 1.0, %v1587_v38 }
 0x371   :  { %v1589_v20 = vpop.eup %1588 }
 0x372   :  { %v1591_v16 = vpop.eup %1590  ;;  %v849_v32 = vmul.f32 %v1589_v20, %v845_v27  ;;  %1592 = vrcp.f32 %v847_v37  ;;  %vm854_vm10 = vweird.f32 %v1589_v20  ;;  %vm883_vm3 = vweird.f32 %v847_v37 }
 0x373   :  { %v864_v14 = vmul.f32 %v1591_v16, %v846_v6  ;;  %1594 = vtanh.f32 %v835_v52  ;;  %vm869_vm11 = vweird.f32 %v1591_v16  ;;  %vm855_vm14 = vmor %vm853_vm12, %vm854_vm10 }
 0x374   :  { %v850_v36 = vsub.f32 1.0, %v849_v32  ;;  %vm870_vm15 = vmor %vm868_vm13, %vm869_vm11 }
 0x375   :  { %v865_v57 = vsub.f32 1.0, %v864_v14 }
 0x376   :  { %v851_v39 = vmul.f32 %v1589_v20, %v850_v36  ;;  %v889_v36 = vand.u32 2147483648, %v847_v37 }
 0x377   :  { %v866_v56 = vmul.f32 %v1591_v16, %v865_v57  ;;  %v903_v57 = vpop.permute.xlu2 %902 }
 0x378   :  { %v1593_v53 = vpop.eup %1592  ;;  %v852_v10 = vadd.f32 %v1589_v20, %v851_v39  ;;  %v890_v62 = vor.u32 1.1754944e-38, %v889_v36  ;;  %vm904_vm6 = vcmp.eq.s32.totalorder %v903_v57, 1 }
 0x379   :  { %v879_v2 = vmul.f32 %v1593_v53, %v847_v37  ;;  %v867_v7 = vadd.f32 %v1591_v16, %v866_v56  ;;  %v1595_v61 = vpop.eup %1594  ;;  %vm884_vm2 = vweird.f32 %v1593_v53 }
 0x37a   :  { %v856_v23 = vsel %vm855_vm14, %v1589_v20, %v852_v10  ;;  %v887_v20 = vand.u32 2147483647, %v847_v37  ;;  %vm885_vm4 = vmor %vm883_vm3, %vm884_vm2 }
 0x37b   :  { %v880_v1 = vsub.f32 1.0, %v879_v2  ;;  %v861_v19 = vsel %vm858_vm0, %v860_v48, %v856_v23  ;;  %v871_v49 = vsel %vm870_vm15, %v1591_v16, %v867_v7 }
 0x37c   :  { %v876_v38 = vsel %vm873_vm1, %v875_v15, %v871_v49  ;;  %v895_v52 = vmul.f32 %v1595_v61, %v861_v19  ;;  %vm888_vm5 = vcmp.eq.f32.partialorder %v887_v20, 8.507059e+37 }
 0x37d   :  { %v894_v32 = vmul.f32 %v876_v38, %v2045_v51  ;;  %v881_v14 = vmul.f32 %v1593_v53, %v880_v1 }
 0x37f   :  { %v2091_v27 = vadd.f32 %v895_v52, %v894_v32  ;;  %v882_v6 = vadd.f32 %v1593_v53, %v881_v14 }
 0x381   :  { %1596 = vtanh.f32 %v2091_v27  ;;  %v886_v31 = vsel %vm885_vm4, %v1593_v53, %v882_v6 }
 0x382   :  { %v891_v39 = vsel %vm888_vm5, %v890_v62, %v886_v31  ;;  %vm1295_vm5 = vcmp.eq.s32.totalorder %v2086_v26, 7 }
 0x387   :  { %v1597_v16 = vpop.eup %1596 }
 0x388   :  { %v898_v63 = vmul.f32 %v1597_v16, %v891_v39  ;;  %v1035_v39 = vpop.permute.xlu2 %1034 }
 0x389   :  { %vm1036_vm4 = vcmp.eq.s32.totalorder %v1035_v39, 1 }
 0x38a   :  { %v2095_v51 = vsel %vm904_vm6, %v898_v63, %v2049_v60  ;;  %v911_v56 = vpack.c.bf16 %v898_v63, %v898_v63 }
 0x38c   :  { %920 = vmatmul.bf16.vlgmr.msrb.gmra.mxu0 %v911_v56  ;;  %933 = vmatmul.bf16.vlgmr.msrb.gmra.mxu1 %v911_v56 }
 0x38d   :  { %946 = vmatmul.bf16.vlgmr.msrb.gmra.mxu2 %v911_v56  ;;  %959 = vmatmul.bf16.vlgmr.msrb.gmra.mxu3 %v911_v56 }
 0x38e   :  { %1176 = vmatpush.bf16.msrb.mxu0 %v1745_v4  ;;  %1189 = vmatpush.bf16.msrb.mxu1 %v1747_v8  ;;  %v907_v4 = vld [vmem:[#allocation3 + $0xa0] sm:$0xff]  ;;  %v908_v8 = vld [vmem:[#allocation3 + $0xa8] sm:$0xff] }
 0x38f   :  { %1202 = vmatpush.bf16.msrb.mxu2 %v1749_v9  ;;  %1215 = vmatpush.bf16.msrb.mxu3 %v1760_v22 }
 0x392   :  { %1177 = vmatpush.bf16.msrb.mxu0 %v1752_v13  ;;  %1190 = vmatpush.bf16.msrb.mxu1 %v1756_v17 }
 0x393   :  { %1203 = vmatpush.bf16.msrb.mxu2 %v1758_v18  ;;  %1216 = vmatpush.bf16.msrb.mxu3 %v1772_v35 }
 0x396   :  { %1178 = vmatpush.bf16.msrb.mxu0 %v1764_v29  ;;  %1191 = vmatpush.bf16.msrb.mxu1 %v1768_v33  ;;  %v909_v33 = vld [vmem:[#allocation3 + $0xb0] sm:$0xff] }
 0x397   :  { %1204 = vmatpush.bf16.msrb.mxu2 %v1770_v34  ;;  %1217 = vmatpush.bf16.msrb.mxu3 %v1778_v43 }
 0x39a   :  { %1179 = vmatpush.bf16.msrb.mxu0 %v1776_v42  ;;  %1192 = vmatpush.bf16.msrb.mxu1 %v1782_v46 }
 0x39b   :  { %1205 = vmatpush.bf16.msrb.mxu2 %v1784_v47  ;;  %1218 = vmatpush.bf16.msrb.mxu3 %v1790_v55 }
 0x39e   :  { %1180 = vmatpush.bf16.msrb.mxu0 %v1788_v54  ;;  %1193 = vmatpush.bf16.msrb.mxu1 %v1794_v58 }
 0x39f   :  { %1206 = vmatpush.bf16.msrb.mxu2 %v1796_v59  ;;  %1219 = vmatpush.bf16.msrb.mxu3 %v1802_v5 }
 0x3a2   :  { %1181 = vmatpush.bf16.msrb.mxu0 %v1800_v3  ;;  %1194 = vmatpush.bf16.msrb.mxu1 %v1806_v11  ;;  %v910_v11 = vld [vmem:[#allocation3 + $0xb8] sm:$0xff] }
 0x3a3   :  { %1207 = vmatpush.bf16.msrb.mxu2 %v1808_v12  ;;  %1220 = vmatpush.bf16.msrb.mxu3 %v1824_v25  ;;  %v1164_v12 = vsel %vm1163_vm7, 1, %v1705_v21 }
 0x3a4   :  { %1166 = vperm.xlu0 %1513, %v1164_v12  }
 0x3a6   :  { %1182 = vmatpush.bf16.msrb.mxu0 %v1822_v24  ;;  %1195 = vmatpush.bf16.msrb.mxu1 %v1828_v28 }
 0x3a7   :  { %1208 = vmatpush.bf16.msrb.mxu2 %v1830_v30  ;;  %1221 = vmatpush.bf16.msrb.mxu3 %v1836_v41 }
 0x3aa   :  { %1183 = vmatpush.bf16.msrb.mxu0 %v1834_v40  ;;  %1196 = vmatpush.bf16.msrb.mxu1 %v1840_v44 }
 0x3ab   :  { %1209 = vmatpush.bf16.msrb.mxu2 %v1842_v45  ;;  %1222 = vmatpush.bf16.msrb.mxu3 %v1848_v50 }
 0x409   :  { %v921_v9 = vpop.f32.mrf.mxu0  ;;  %v934_v13 = vpop.f32.mrf.mxu1 }
 0x40a   :  { %v964_v17 = vadd.f32 %v921_v9, %v907_v4  ;;  %v965_v18 = vadd.f32 %v934_v13, %v908_v8 }
 0x40c   :  { %v1465_v22 = vmul.f32 -1.442695, %v964_v17  ;;  %v1466_v29 = vmul.f32 -1.442695, %v965_v18  ;;  %v1039_v17 = vld [vmem:[#allocation3 + $0xc0] sm:$0xff]  ;;  %v1040_v18 = vld [vmem:[#allocation3 + $0xc8] sm:$0xff] }
 0x40e   :  { %1598 = vpow2.f32 %v1465_v22 }
 0x40f   :  { %1600 = vpow2.f32 %v1466_v29 }
 0x410   :  { %v947_v34 = vpop.f32.mrf.mxu2  ;;  %v960_v35 = vpop.f32.mrf.mxu3 }
 0x411   :  { %v966_v42 = vadd.f32 %v947_v34, %v909_v33  ;;  %v923_v43 = vpop.f32.mrf.mxu0  ;;  %v936_v46 = vpop.f32.mrf.mxu1  ;;  %v967_v30 = vadd.f32 %v960_v35, %v910_v11 }
 0x412   :  { %v1041_v43 = vld [vmem:[#allocation3 + $0xd0] sm:$0xff] }
 0x413   :  { %v1467_v47 = vmul.f32 -1.442695, %v966_v42 }
 0x414   :  { %v1599_v54 = vpop.eup %1598 }
 0x415   :  { %v1601_v55 = vpop.eup %1600  ;;  %v977_v58 = vadd.f32 1.0, %v1599_v54  ;;  %1602 = vpow2.f32 %v1467_v47 }
 0x416   :  { %v978_v59 = vadd.f32 1.0, %v1601_v55 }
 0x417   :  { %1604 = vrcp.f32 %v977_v58  ;;  %v991_v60 = vand.u32 2147483648, %v977_v58  ;;  %v989_v53 = vand.u32 2147483647, %v977_v58  ;;  %vm985_vm10 = vweird.f32 %v977_v58 }
 0x418   :  { %1606 = vrcp.f32 %v978_v59  ;;  %v949_v3 = vpop.f32.mrf.mxu2  ;;  %v962_v5 = vpop.f32.mrf.mxu3  ;;  %v1006_v37 = vand.u32 2147483648, %v978_v59  ;;  %v1004_v2 = vand.u32 2147483647, %v978_v59  ;;  %vm1000_vm11 = vweird.f32 %v978_v59 }
 0x419   :  { %v992_v23 = vor.u32 1.1754944e-38, %v991_v60  ;;  %vm990_vm14 = vcmp.eq.f32.partialorder %v989_v53, 8.507059e+37 }
 0x41a   :  { %v1007_v1 = vor.u32 1.1754944e-38, %v1006_v37  ;;  %vm1005_vm15 = vcmp.eq.f32.partialorder %v1004_v2, 8.507059e+37 }
 0x41b   :  { %v1603_v24 = vpop.eup %1602 }
 0x41c   :  { %v979_v25 = vadd.f32 1.0, %v1603_v24 }
 0x41d   :  { %v1605_v28 = vpop.eup %1604 }
 0x41e   :  { %v1607_v40 = vpop.eup %1606  ;;  %v981_v41 = vmul.f32 %v1605_v28, %v977_v58  ;;  %1608 = vrcp.f32 %v979_v25  ;;  %vm986_vm8 = vweird.f32 %v1605_v28  ;;  %v1021_v62 = vand.u32 2147483648, %v979_v25 }
 0x41f   :  { %v996_v44 = vmul.f32 %v1607_v40, %v978_v59  ;;  %1610 = vtanh.f32 %v967_v30  ;;  %vm1001_vm9 = vweird.f32 %v1607_v40  ;;  %vm987_vm12 = vmor %vm985_vm10, %vm986_vm8  ;;  %vm1015_vm1 = vweird.f32 %v979_v25 }
 0x420   :  { %v982_v45 = vsub.f32 1.0, %v981_v41  ;;  %vm1002_vm13 = vmor %vm1000_vm11, %vm1001_vm9  ;;  %v1019_v16 = vand.u32 2147483647, %v979_v25  ;;  %v1022_v56 = vor.u32 1.1754944e-38, %v1021_v62 }
 0x421   :  { %v997_v50 = vsub.f32 1.0, %v996_v44 }
 0x422   :  { %v983_v0 = vmul.f32 %v1605_v28, %v982_v45  ;;  %vm1020_vm3 = vcmp.eq.f32.partialorder %v1019_v16, 8.507059e+37 }
 0x423   :  { %v998_v10 = vmul.f32 %v1607_v40, %v997_v50 }
 0x424   :  { %v1609_v48 = vpop.eup %1608  ;;  %v984_v7 = vadd.f32 %v1605_v28, %v983_v0 }
 0x425   :  { %v1011_v15 = vmul.f32 %v1609_v48, %v979_v25  ;;  %v999_v61 = vadd.f32 %v1607_v40, %v998_v10  ;;  %v1611_v49 = vpop.eup %1610  ;;  %vm1016_vm0 = vweird.f32 %v1609_v48  ;;  %v1042_v25 = vld [vmem:[#allocation3 + $0xd8] sm:$0xff] }
 0x426   :  { %v988_v19 = vsel %vm987_vm12, %v1605_v28, %v984_v7  ;;  %vm1017_vm2 = vmor %vm1015_vm1, %vm1016_vm0  ;;  %v1296_v28 = vsel %vm1295_vm5, 1, %v1705_v21 }
 0x427   :  { %v1012_v38 = vsub.f32 1.0, %v1011_v15  ;;  %v993_v52 = vsel %vm990_vm14, %v992_v23, %v988_v19  ;;  %v1003_v32 = vsel %vm1002_vm13, %v1607_v40, %v999_v61  ;;  %1298 = vperm.xlu1 %1514, %v1296_v28   ;;  %v1174_v28 = vld [vmem:[#allocation3 + $0xf8] sm:$0xff] }
 0x428   :  { %v1008_v14 = vsel %vm1005_vm15, %v1007_v1, %v1003_v32  ;;  %v1027_v6 = vmul.f32 %v1611_v49, %v993_v52 }
 0x429   :  { %v1026_v36 = vmul.f32 %v1008_v14, %v2091_v27  ;;  %v1013_v20 = vmul.f32 %v1609_v48, %v1012_v38 }
 0x42b   :  { %v2132_v57 = vadd.f32 %v1027_v6, %v1026_v36  ;;  %v1014_v31 = vadd.f32 %v1609_v48, %v1013_v20 }
 0x42d   :  { %1612 = vtanh.f32 %v2132_v57  ;;  %v1018_v63 = vsel %vm1017_vm2, %v1609_v48, %v1014_v31 }
 0x42e   :  { %v1023_v8 = vsel %vm1020_vm3, %v1022_v56, %v1018_v63  ;;  %v1167_v56 = vpop.permute.xlu0 %1166 }
 0x42f   :  { %vm1168_vm2 = vcmp.eq.s32.totalorder %v1167_v56, 1 }
 0x433   :  { %v1613_v4 = vpop.eup %1612 }
 0x434   :  { %v1030_v9 = vmul.f32 %v1613_v4, %v1023_v8 }
 0x436   :  { %v2136_v27 = vsel %vm1036_vm4, %v1030_v9, %v2095_v51  ;;  %v1043_v13 = vpack.c.bf16 %v1030_v9, %v1030_v9 }
 0x438   :  { %1052 = vmatmul.bf16.vlgmr.msra.gmra.mxu0 %v1043_v13  ;;  %1065 = vmatmul.bf16.vlgmr.msra.gmra.mxu1 %v1043_v13 }
 0x439   :  { %1078 = vmatmul.bf16.vlgmr.msra.gmra.mxu2 %v1043_v13  ;;  %1091 = vmatmul.bf16.vlgmr.msra.gmra.mxu3 %v1043_v13 }
 0x4b5   :  { %v1053_v22 = vpop.f32.mrf.mxu0  ;;  %v1066_v29 = vpop.f32.mrf.mxu1 }
 0x4b6   :  { %v1096_v33 = vadd.f32 %v1053_v22, %v1039_v17  ;;  %v1097_v34 = vadd.f32 %v1066_v29, %v1040_v18  ;;  %v1171_v22 = vld [vmem:[#allocation3 + $0xe0] sm:$0xff]  ;;  %v1172_v29 = vld [vmem:[#allocation3 + $0xe8] sm:$0xff] }
 0x4b8   :  { %v1468_v35 = vmul.f32 -1.442695, %v1096_v33  ;;  %v1469_v42 = vmul.f32 -1.442695, %v1097_v34 }
 0x4ba   :  { %1614 = vpow2.f32 %v1468_v35 }
 0x4bb   :  { %1616 = vpow2.f32 %v1469_v42 }
 0x4bc   :  { %v1079_v46 = vpop.f32.mrf.mxu2  ;;  %v1092_v47 = vpop.f32.mrf.mxu3 }
 0x4bd   :  { %v1098_v51 = vadd.f32 %v1079_v46, %v1041_v43  ;;  %v1055_v54 = vpop.f32.mrf.mxu0  ;;  %v1068_v55 = vpop.f32.mrf.mxu1  ;;  %v1099_v44 = vadd.f32 %v1092_v47, %v1042_v25  ;;  %v1173_v47 = vld [vmem:[#allocation3 + $0xf0] sm:$0xff] }
 0x4bf   :  { %v1470_v58 = vmul.f32 -1.442695, %v1098_v51 }
 0x4c0   :  { %v1615_v59 = vpop.eup %1614 }
 0x4c1   :  { %v1617_v3 = vpop.eup %1616  ;;  %v1109_v5 = vadd.f32 1.0, %v1615_v59  ;;  %1618 = vpow2.f32 %v1470_v58 }
 0x4c2   :  { %v1110_v11 = vadd.f32 1.0, %v1617_v3 }
 0x4c3   :  { %1620 = vrcp.f32 %v1109_v5  ;;  %v1123_v53 = vand.u32 2147483648, %v1109_v5  ;;  %v1121_v26 = vand.u32 2147483647, %v1109_v5  ;;  %vm1117_vm8 = vweird.f32 %v1109_v5 }
 0x4c4   :  { %1622 = vrcp.f32 %v1110_v11  ;;  %v1081_v12 = vpop.f32.mrf.mxu2  ;;  %v1094_v24 = vpop.f32.mrf.mxu3  ;;  %v1138_v10 = vand.u32 2147483648, %v1110_v11  ;;  %v1136_v21 = vand.u32 2147483647, %v1110_v11  ;;  %vm1132_vm9 = vweird.f32 %v1110_v11 }
 0x4c5   :  { %v1124_v61 = vor.u32 1.1754944e-38, %v1123_v53  ;;  %vm1122_vm12 = vcmp.eq.f32.partialorder %v1121_v26, 8.507059e+37 }
 0x4c6   :  { %v1139_v19 = vor.u32 1.1754944e-38, %v1138_v10  ;;  %vm1137_vm13 = vcmp.eq.f32.partialorder %v1136_v21, 8.507059e+37 }
 0x4c7   :  { %v1619_v30 = vpop.eup %1618 }
 0x4c8   :  { %v1111_v40 = vadd.f32 1.0, %v1619_v30 }
 0x4c9   :  { %v1621_v41 = vpop.eup %1620 }
 0x4ca   :  { %v1623_v45 = vpop.eup %1622  ;;  %v1113_v50 = vmul.f32 %v1621_v41, %v1109_v5  ;;  %1624 = vrcp.f32 %v1111_v40  ;;  %vm1118_vm6 = vweird.f32 %v1621_v41  ;;  %v1153_v39 = vand.u32 2147483648, %v1111_v40 }
 0x4cb   :  { %v1128_v60 = vmul.f32 %v1623_v45, %v1110_v11  ;;  %1626 = vtanh.f32 %v1099_v44  ;;  %vm1133_vm7 = vweird.f32 %v1623_v45  ;;  %vm1119_vm10 = vmor %vm1117_vm8, %vm1118_vm6  ;;  %vm1147_vm15 = vweird.f32 %v1111_v40 }
 0x4cc   :  { %v1114_v37 = vsub.f32 1.0, %v1113_v50  ;;  %vm1134_vm11 = vmor %vm1132_vm9, %vm1133_vm7  ;;  %v1151_v63 = vand.u32 2147483647, %v1111_v40  ;;  %v1154_v8 = vor.u32 1.1754944e-38, %v1153_v39 }
 0x4cd   :  { %v1129_v0 = vsub.f32 1.0, %v1128_v60 }
 0x4ce   :  { %v1115_v2 = vmul.f32 %v1621_v41, %v1114_v37  ;;  %vm1152_vm1 = vcmp.eq.f32.partialorder %v1151_v63, 8.507059e+37 }
 0x4cf   :  { %v1130_v48 = vmul.f32 %v1623_v45, %v1129_v0 }
 0x4d0   :  { %v1625_v7 = vpop.eup %1624  ;;  %v1116_v15 = vadd.f32 %v1621_v41, %v1115_v2 }
 0x4d1   :  { %v1143_v23 = vmul.f32 %v1625_v7, %v1111_v40  ;;  %v1131_v1 = vadd.f32 %v1623_v45, %v1130_v48  ;;  %v1627_v38 = vpop.eup %1626  ;;  %vm1148_vm14 = vweird.f32 %v1625_v7 }
 0x4d2   :  { %v1120_v49 = vsel %vm1119_vm10, %v1621_v41, %v1116_v15  ;;  %vm1149_vm0 = vmor %vm1147_vm15, %vm1148_vm14 }
 0x4d3   :  { %v1144_v52 = vsub.f32 1.0, %v1143_v23  ;;  %v1125_v32 = vsel %vm1122_vm12, %v1124_v61, %v1120_v49  ;;  %v1135_v14 = vsel %vm1134_vm11, %v1623_v45, %v1131_v1 }
 0x4d4   :  { %v1140_v6 = vsel %vm1137_vm13, %v1139_v19, %v1135_v14  ;;  %v1159_v36 = vmul.f32 %v1627_v38, %v1125_v32 }
 0x4d5   :  { %v1158_v20 = vmul.f32 %v1140_v6, %v2132_v57  ;;  %v1145_v31 = vmul.f32 %v1625_v7, %v1144_v52 }
 0x4d7   :  { %v2141_v62 = vadd.f32 %v1159_v36, %v1158_v20  ;;  %v1146_v16 = vadd.f32 %v1625_v7, %v1145_v31 }
 0x4d9   :  { %1628 = vtanh.f32 %v2141_v62  ;;  %v1150_v4 = vsel %vm1149_vm0, %v1625_v7, %v1146_v16  ;;  %vm1314_vm0 = vcmask 7168  }
 0x4da   :  { %v1155_v13 = vsel %vm1152_vm1, %v1154_v8, %v1150_v4 }
 0x4df   :  { %v1629_v9 = vpop.eup %1628 }
 0x4e0   :  { %v1162_v17 = vmul.f32 %v1629_v9, %v1155_v13  ;;  %v1299_v9 = vpop.permute.xlu1 %1298 }
 0x4e1   :  { %vm1300_vm15 = vcmp.eq.s32.totalorder %v1299_v9, 1 }
 0x4e2   :  { %v2145_v57 = vsel %vm1168_vm2, %v1162_v17, %v2136_v27  ;;  %v1175_v18 = vpack.c.bf16 %v1162_v17, %v1162_v17 }
 0x4e4   :  { %1184 = vmatmul.bf16.vlgmr.msrb.gmra.mxu0 %v1175_v18  ;;  %1197 = vmatmul.bf16.vlgmr.msrb.gmra.mxu1 %v1175_v18 }
 0x4e5   :  { %1210 = vmatmul.bf16.vlgmr.msrb.gmra.mxu2 %v1175_v18  ;;  %1223 = vmatmul.bf16.vlgmr.msrb.gmra.mxu3 %v1175_v18  ;;  %v1516_v18 = vld [vmem:[%s2158_s3] ss:$0 sm:$0xff] }
 0x561   :  { %v1185_v33 = vpop.f32.mrf.mxu0  ;;  %v1198_v34 = vpop.f32.mrf.mxu1 }
 0x562   :  { %v1228_v35 = vadd.f32 %v1185_v33, %v1171_v22  ;;  %v1229_v42 = vadd.f32 %v1198_v34, %v1172_v29  ;;  %v1517_v33 = vld [vmem:[#allocation2] ss:$0 sm:$0xff] }
 0x564   :  { %v1471_v43 = vmul.f32 -1.442695, %v1228_v35  ;;  %v1472_v46 = vmul.f32 -1.442695, %v1229_v42 }
 0x566   :  { %1630 = vpow2.f32 %v1471_v43 }
 0x567   :  { %1632 = vpow2.f32 %v1472_v46 }
 0x568   :  { %v1211_v51 = vpop.f32.mrf.mxu2  ;;  %v1224_v54 = vpop.f32.mrf.mxu3 }
 0x569   :  { %v1230_v27 = vadd.f32 %v1211_v51, %v1173_v47  ;;  %v1187_v55 = vpop.f32.mrf.mxu0  ;;  %v1200_v58 = vpop.f32.mrf.mxu1  ;;  %v1231_v44 = vadd.f32 %v1224_v54, %v1174_v28 }
 0x56b   :  { %v1473_v59 = vmul.f32 -1.442695, %v1230_v27 }
 0x56c   :  { %v1631_v3 = vpop.eup %1630 }
 0x56d   :  { %v1633_v5 = vpop.eup %1632  ;;  %v1241_v11 = vadd.f32 1.0, %v1631_v3  ;;  %1634 = vpow2.f32 %v1473_v59 }
 0x56e   :  { %v1242_v12 = vadd.f32 1.0, %v1633_v5 }
 0x56f   :  { %1636 = vrcp.f32 %v1241_v11  ;;  %v1255_v53 = vand.u32 2147483648, %v1241_v11  ;;  %v1253_v26 = vand.u32 2147483647, %v1241_v11  ;;  %vm1249_vm5 = vweird.f32 %v1241_v11 }
 0x570   :  { %1638 = vrcp.f32 %v1242_v12  ;;  %v1213_v24 = vpop.f32.mrf.mxu2  ;;  %v1226_v25 = vpop.f32.mrf.mxu3  ;;  %v1270_v10 = vand.u32 2147483648, %v1242_v12  ;;  %v1268_v21 = vand.u32 2147483647, %v1242_v12  ;;  %vm1264_vm6 = vweird.f32 %v1242_v12 }
 0x571   :  { %v1256_v61 = vor.u32 1.1754944e-38, %v1255_v53  ;;  %vm1254_vm9 = vcmp.eq.f32.partialorder %v1253_v26, 8.507059e+37 }
 0x572   :  { %v1271_v19 = vor.u32 1.1754944e-38, %v1270_v10  ;;  %vm1269_vm10 = vcmp.eq.f32.partialorder %v1268_v21, 8.507059e+37 }
 0x573   :  { %v1635_v30 = vpop.eup %1634 }
 0x574   :  { %v1243_v40 = vadd.f32 1.0, %v1635_v30 }
 0x575   :  { %v1637_v41 = vpop.eup %1636 }
 0x576   :  { %v1639_v45 = vpop.eup %1638  ;;  %v1245_v50 = vmul.f32 %v1637_v41, %v1241_v11  ;;  %1640 = vrcp.f32 %v1243_v40  ;;  %vm1250_vm3 = vweird.f32 %v1637_v41  ;;  %v1285_v63 = vand.u32 2147483648, %v1243_v40 }
 0x577   :  { %v1260_v60 = vmul.f32 %v1639_v45, %v1242_v12  ;;  %1642 = vtanh.f32 %v1231_v44  ;;  %vm1265_vm4 = vweird.f32 %v1639_v45  ;;  %vm1251_vm7 = vmor %vm1249_vm5, %vm1250_vm3  ;;  %vm1279_vm12 = vweird.f32 %v1243_v40 }
 0x578   :  { %v1246_v37 = vsub.f32 1.0, %v1245_v50  ;;  %vm1266_vm8 = vmor %vm1264_vm6, %vm1265_vm4  ;;  %v1283_v56 = vand.u32 2147483647, %v1243_v40  ;;  %v1286_v8 = vor.u32 1.1754944e-38, %v1285_v63 }
 0x579   :  { %v1261_v0 = vsub.f32 1.0, %v1260_v60 }
 0x57a   :  { %v1247_v2 = vmul.f32 %v1637_v41, %v1246_v37  ;;  %vm1284_vm14 = vcmp.eq.f32.partialorder %v1283_v56, 8.507059e+37 }
 0x57b   :  { %v1262_v48 = vmul.f32 %v1639_v45, %v1261_v0 }
 0x57c   :  { %v1641_v7 = vpop.eup %1640  ;;  %v1248_v15 = vadd.f32 %v1637_v41, %v1247_v2 }
 0x57d   :  { %v1275_v23 = vmul.f32 %v1641_v7, %v1243_v40  ;;  %v1263_v1 = vadd.f32 %v1639_v45, %v1262_v48  ;;  %v1643_v38 = vpop.eup %1642  ;;  %vm1280_vm11 = vweird.f32 %v1641_v7 }
 0x57e   :  { %v1252_v49 = vsel %vm1251_vm7, %v1637_v41, %v1248_v15  ;;  %vm1281_vm13 = vmor %vm1279_vm12, %vm1280_vm11 }
 0x57f   :  { %v1276_v52 = vsub.f32 1.0, %v1275_v23  ;;  %v1257_v32 = vsel %vm1254_vm9, %v1256_v61, %v1252_v49  ;;  %v1267_v14 = vsel %vm1266_vm8, %v1639_v45, %v1263_v1 }
 0x580   :  { %v1272_v6 = vsel %vm1269_vm10, %v1271_v19, %v1267_v14  ;;  %v1291_v36 = vmul.f32 %v1643_v38, %v1257_v32 }
 0x581   :  { %v1290_v20 = vmul.f32 %v1272_v6, %v2141_v62  ;;  %v1277_v31 = vmul.f32 %v1641_v7, %v1276_v52 }
 0x583   :  { %v1292_v16 = vadd.f32 %v1291_v36, %v1290_v20  ;;  %v1278_v39 = vadd.f32 %v1641_v7, %v1277_v31 }
 0x585   :  { %1644 = vtanh.f32 %v1292_v16  ;;  %v1282_v4 = vsel %vm1281_vm13, %v1641_v7, %v1278_v39 }
 0x586   :  { %v1287_v17 = vsel %vm1284_vm14, %v1286_v8, %v1282_v4 }
 0x58b   :  { %v1645_v13 = vpop.eup %1644 }
 0x58c   :  { %v1294_v62 = vmul.f32 %v1645_v13, %v1287_v17 }
 0x58e   :  { %v1301_v22 = vsel %vm1300_vm15, %v1294_v62, %v2145_v57 }
 0x58f   :  { %v1306_v29 = vmul.f32 %v1516_v18, %v1301_v22 }
 0x591   :  { %1307 = vadd.xlane.f32.xlu2 %v1306_v29 }
 0x604   :  { %v1308_v34 = vpop.xlane.xlu2 %1307 }
 0x605   :  { %v1313_v35 = vadd.f32 %v1517_v33, %v1308_v34 }
 0x607   :  { %1315 = vst.msk [vmem:[%s2160_s5] sm:$0xff] %vm1314_vm0, %v1313_v35 }
 0x608   :  { %1320 = vsyncpa [#allocation4], 1 }
 0x609   :  { %1321 = vsyncpa [#allocation6], 1 }

</bundles_post_ra>
